<compile_context>
chip_gen: v7x
topology: tpu7x:2x2x1
jax: 0.10.0
libtpu: 0.0.40
codegen_flags: <defaults>
</compile_context>

<pallas_src>
import jax
import jax.numpy as jnp
import numpy as np
from jax.experimental import pallas as pl
from jax.experimental.pallas import tpu as pltpu


def _layer_norm(x, g, b, eps=1e-5):
    mu = jnp.mean(x, axis=-1, keepdims=True)
    var = jnp.mean(jnp.square(x - mu), axis=-1, keepdims=True)
    return (x - mu) * jax.lax.rsqrt(var + eps) * g + b


# --------------------------- kernel 1: LN1 + QKV projection ---------------------------
def ln_qkv_kernel(x_ref, g1_ref, b1_ref, wqkv_ref, bqkv_ref, q_ref, k_ref, v_ref):
    x = x_ref[0].astype(jnp.float32)                       # (TR, C)
    c = x.shape[-1]
    n_head, d = q_ref.shape[1], q_ref.shape[3]
    xn = _layer_norm(x, g1_ref[0], b1_ref[0]).astype(jnp.bfloat16)
    qkv = jnp.dot(xn, wqkv_ref[...],
                  preferred_element_type=jnp.float32) + bqkv_ref[0]   # (TR, 3C) f32
    sc = 1.0 / float(np.sqrt(d))
    # NOTE: the PyTorch module chunks as (k, q, v) in that order.  Per-head static lane
    # slices + stores write the head-major layout directly (XLU work hidden under the
    # QKV matmul); no jnp.transpose needed.
    for h in range(n_head):
        lo = h * d
        k_ref[0, h] = qkv[:, lo:lo + d].astype(jnp.bfloat16)
        q_ref[0, h] = (qkv[:, c + lo:c + lo + d] * sc).astype(jnp.bfloat16)
        v_ref[0, h] = qkv[:, 2 * c + lo:2 * c + lo + d].astype(jnp.bfloat16)


# ------------- kernel 2: flash attention + proj + residual + LN2 + FFN -------------
def attn_ffn_kernel(x_ref, q_ref, k_ref, v_ref,
                    wpr_ref, bpr_ref, g2_ref, b2_ref,
                    wfc_ref, bfc_ref, wf2_ref, bf2_ref,
                    o_ref, m_s, l_s, acc_s):
    qi = pl.program_id(1)
    ki = pl.program_id(2)
    n_head, tq = q_ref.shape[1], q_ref.shape[2]
    tk = k_ref.shape[2]

    @pl.when(ki == 0)
    def _init():
        m_s[...] = jnp.full(m_s.shape, -1e30, jnp.float32)
        l_s[...] = jnp.zeros(l_s.shape, jnp.float32)
        acc_s[...] = jnp.zeros(acc_s.shape, jnp.float32)

    def _online_softmax_step(masked):
        q = q_ref[0]                                       # (H, TQ, D) bf16, pre-scaled
        k = k_ref[0]                                       # (H, TK, D) bf16
        v = v_ref[0]                                       # (H, TK, D) bf16
        s = jax.lax.dot_general(                           # (H, TQ, TK) f32
            q, k, (((2,), (2,)), ((0,), (0,))),
            preferred_element_type=jnp.float32)
        if masked:
            # Diagonal tile only (tq == tk, qi == ki): the absolute offsets cancel,
            # so a local lower-triangular mask is exact.
            rows = jax.lax.broadcasted_iota(jnp.int32, (tq, tk), 0)
            cols = jax.lax.broadcasted_iota(jnp.int32, (tq, tk), 1)
            s = jnp.where((cols <= rows)[None, :, :], s, -1e30)

        m_prev = m_s[...]
        m_new = jnp.maximum(m_prev, jnp.max(s, axis=-1, keepdims=True))
        alpha = jnp.exp(m_prev - m_new)
        p = jnp.exp(s - m_new)
        l_s[...] = alpha * l_s[...] + jnp.sum(p, axis=-1, keepdims=True)
        acc_s[...] = alpha * acc_s[...] + jax.lax.dot_general(
            p.astype(v.dtype), v, (((2,), (1,)), ((0,), (0,))),
            preferred_element_type=jnp.float32)
        m_s[...] = m_new

    # tq == tk (enforced by the wrapper): strictly-below-diagonal tiles need no mask,
    # the diagonal tile gets the triangular mask, above-diagonal tiles are skipped
    # (and their k/v DMAs are suppressed via the clamped index maps).
    @pl.when(ki < qi)
    def _below_diag():
        _online_softmax_step(False)

    @pl.when(ki == qi)
    def _on_diag():
        _online_softmax_step(True)

    @pl.when(ki == pl.num_programs(2) - 1)
    def _finalize():
        x = x_ref[0].astype(jnp.float32)                   # (TQ, C)
        c = x.shape[-1]
        inv_l = pl.reciprocal(l_s[...], approx=True)       # (H, TQ, 1)
        # Lane-concat heads once -> (TQ, C), then one full-contraction projection.
        y2 = jnp.concatenate(
            [(acc_s[h] * inv_l[h]).astype(jnp.bfloat16) for h in range(n_head)],
            axis=-1)                                       # (TQ, C) bf16, head-major
        y = jnp.dot(y2, wpr_ref[...],
                    preferred_element_type=jnp.float32) + bpr_ref[0]
        x1 = x + y                                         # first residual

        xn2 = _layer_norm(x1, g2_ref[0], b2_ref[0]).astype(jnp.bfloat16)
        n_chunks = wfc_ref.shape[0]

        def ffn_body(ci, acc):
            h = jnp.dot(xn2, wfc_ref[ci],
                        preferred_element_type=jnp.float32) + bfc_ref[ci]
            h = jax.nn.gelu(h, approximate=False)          # exact erf GELU (nn.GELU())
            return acc + jnp.dot(h.astype(jnp.bfloat16), wf2_ref[ci],
                                 preferred_element_type=jnp.float32)

        ffn = jax.lax.fori_loop(0, n_chunks, ffn_body,
                                jnp.zeros((tq, c), jnp.float32))
        o_ref[0] = (x1 + ffn + bf2_ref[0]).astype(o_ref.dtype)


# ----------------------------------- wrapper -----------------------------------
def _const_spec(shape, grid_rank):
    """Full-array weight BlockSpec: constant index_map + single-buffered pipeline."""
    zero = (0,) * len(shape)
    if grid_rank == 2:
        imap = lambda b, r: zero
    else:
        imap = lambda b, i, j: zero
    return pl.BlockSpec(shape, imap, pipeline_mode=pl.Buffered(1))


def _vmem_limit_bytes(weights, act_bytes):
    """Resident (single-buffered) weights + activation tiles + headroom, capped at a
    fraction of this generation's physical VMEM (leaves Mosaic internal scratch room)."""
    cap_phys = 64 << 20
    try:
        cap_phys = int(pltpu.get_tpu_info().vmem_capacity_bytes)
    except Exception:
        pass
    cap = int(cap_phys * 0.8)
    wbytes = sum(int(np.prod(w.shape)) * w.dtype.itemsize for w in weights)
    need = int((wbytes + act_bytes) * 1.25) + (4 << 20)
    return max(min(need, cap), min(32 << 20, cap))


def transformer_block(x, params, n_head, *, seq_tile=128, ffn_chunk=2048):
    B, T, C = x.shape
    assert C % n_head == 0
    D = C // n_head
    tile = min(seq_tile, T)
    assert T % tile == 0, "sequence length must be divisible by the tile size"
    tr = tq = tk = tile                                    # tq == tk is assumed by the kernel

    hidden = 4 * C
    ffn_chunk = min(ffn_chunk, hidden)
    assert hidden % ffn_chunk == 0 and ffn_chunk % 128 == 0
    n_chunks = hidden // ffn_chunk

    f32, bf16 = jnp.float32, jnp.bfloat16
    g1, b1 = params["g1"].astype(f32), params["b1"].astype(f32)
    g2, b2 = params["g2"].astype(f32), params["b2"].astype(f32)
    bqkv, bpr = params["bqkv"].astype(f32), params["bpr"].astype(f32)
    bf2 = params["bf2"].astype(f32)
    # bf16 matmul inputs (accumulation stays f32 inside the kernels).
    wqkv = params["wqkv"].astype(bf16)                     # (C, 3C)
    wpr = params["wpr"].astype(bf16)                       # (C, C) — full-contraction proj
    # Pre-chunk the FFN weights along the hidden (4C) dim so the kernel can walk them
    # with a dynamic leading-axis index (bounded per-chunk VMEM/vreg pressure).
    wfc_c = params["wfc"].astype(bf16).reshape(C, n_chunks, ffn_chunk).transpose(1, 0, 2)
    bfc_c = params["bfc"].astype(f32).reshape(n_chunks, 1, ffn_chunk)
    wf2_c = params["wf2"].astype(bf16).reshape(n_chunks, ffn_chunk, C)

    # ---- kernel 1: LN1 + QKV (head-major outputs) ----
    k1_weights = (g1, b1, wqkv, bqkv)
    act1 = (2 * tr * C) * 4 + (tr * 3 * C) * 4 + (2 * 3 * tr * C) * 2
    vmem1 = _vmem_limit_bytes(k1_weights, act1)
    qkv_shape = jax.ShapeDtypeStruct((B, n_head, T, D), bf16)
    q, k, v = pl.pallas_call(
        ln_qkv_kernel,
        out_shape=(qkv_shape, qkv_shape, qkv_shape),
        grid_spec=pltpu.PrefetchScalarGridSpec(
            num_scalar_prefetch=0,
            grid=(B, T // tr),
            in_specs=[pl.BlockSpec((1, tr, C), lambda b, r: (b, r, 0))]
                     + [_const_spec(w.shape, 2) for w in k1_weights],
            out_specs=tuple(
                pl.BlockSpec((1, n_head, tr, D), lambda b, r: (b, 0, r, 0))
                for _ in range(3)),
        ),
        compiler_params=pltpu.CompilerParams(
            dimension_semantics=("parallel", "parallel"),
            vmem_limit_bytes=vmem1),
    )(x, *k1_weights)

    # ---- kernel 2: flash attention + proj + residual + LN2 + FFN ----
    k2_weights = (wpr, bpr, g2, b2, wfc_c, bfc_c, wf2_c, bf2)
    act2 = (2 * 2 * tq * C) * 4 \
           + (2 * (tq + 2 * tk) * C) * 2 \
           + (n_head * tq * (D + 2)) * 4 \
           + (2 * n_head * tq * tk) * 4 \
           + (4 * tq * C + 2 * tq * ffn_chunk) * 4
    vmem2 = _vmem_limit_bytes(k2_weights, act2)

    # Clamp the KV block index to the causal boundary: above-diagonal steps re-request
    # the previous block, so Pallas skips the DMA entirely.
    causal_kv = lambda b, i, j: (b, 0, jnp.minimum(i, j), 0)

    out = pl.pallas_call(
        attn_ffn_kernel,
        out_shape=jax.ShapeDtypeStruct((B, T, C), x.dtype),
        grid_spec=pltpu.PrefetchScalarGridSpec(
            num_scalar_prefetch=0,
            grid=(B, T // tq, T // tk),
            in_specs=[
                pl.BlockSpec((1, tq, C), lambda b, i, j: (b, i, 0)),             # x (residual)
                pl.BlockSpec((1, n_head, tq, D), lambda b, i, j: (b, 0, i, 0)),  # q
                pl.BlockSpec((1, n_head, tk, D), causal_kv),                     # k
                pl.BlockSpec((1, n_head, tk, D), causal_kv),                     # v
            ] + [_const_spec(w.shape, 3) for w in k2_weights],
            out_specs=pl.BlockSpec((1, tq, C), lambda b, i, j: (b, i, 0)),
            scratch_shapes=[
                pltpu.VMEM((n_head, tq, 1), jnp.float32),    # running max
                pltpu.VMEM((n_head, tq, 1), jnp.float32),    # running denominator
                pltpu.VMEM((n_head, tq, D), jnp.float32),    # running numerator
            ],
        ),
        compiler_params=pltpu.CompilerParams(
            dimension_semantics=("parallel", "parallel", "arbitrary"),
            vmem_limit_bytes=vmem2),
    )(x, q, k, v, *k2_weights)
    return out


# --------------------------------- pure-JAX reference ---------------------------------
def reference_block(x, p, n_head):
    def ln(t, g, b):
        mu = t.mean(-1, keepdims=True)
        var = ((t - mu) ** 2).mean(-1, keepdims=True)
        return (t - mu) / jnp.sqrt(var + 1e-5) * g + b

    B, T, C = x.shape
    D = C // n_head
    xn = ln(x, p["g1"][0], p["b1"][0])
    qkv = xn @ p["wqkv"] + p["bqkv"][0]
    k, q, v = jnp.split(qkv, 3, axis=-1)                   # PyTorch chunk order: k, q, v

    def heads(t):
        return t.reshape(B, T, n_head, D).transpose(0, 2, 1, 3)

    q, k, v = heads(q), heads(k), heads(v)
    att = (q @ k.transpose(0, 1, 3, 2)) / jnp.sqrt(jnp.float32(D))
    mask = jnp.tril(jnp.ones((T, T), bool))
    att = jnp.where(mask, att, -jnp.inf)
    att = jax.nn.softmax(att, axis=-1)
    y = (att @ v).transpose(0, 2, 1, 3).reshape(B, T, C)
    y = y @ p["wpr"] + p["bpr"][0]
    x1 = x + y
    xn2 = ln(x1, p["g2"][0], p["b2"][0])
    h = jax.nn.gelu(xn2 @ p["wfc"] + p["bfc"][0], approximate=False)
    return x1 + h @ p["wf2"] + p["bf2"][0]


if __name__ == "__main__":
    B, T, C, n_head = 2, 128, 128, 4      # small, lane-dense (C multiple of 128)

    key = jax.random.PRNGKey(0)
    ks = jax.random.split(key, 10)
    scale = 0.02
    params = {
        "g1": jnp.ones((1, C), jnp.float32),
        "b1": jnp.zeros((1, C), jnp.float32),
        "wqkv": scale * jax.random.normal(ks[0], (C, 3 * C), jnp.float32),
        "bqkv": scale * jax.random.normal(ks[1], (1, 3 * C), jnp.float32),
        "wpr": scale * jax.random.normal(ks[2], (C, C), jnp.float32),
        "bpr": scale * jax.random.normal(ks[3], (1, C), jnp.float32),
        "g2": jnp.ones((1, C), jnp.float32),
        "b2": jnp.zeros((1, C), jnp.float32),
        "wfc": scale * jax.random.normal(ks[4], (C, 4 * C), jnp.float32),
        "bfc": scale * jax.random.normal(ks[5], (1, 4 * C), jnp.float32),
        "wf2": scale * jax.random.normal(ks[6], (4 * C, C), jnp.float32),
        "bf2": scale * jax.random.normal(ks[7], (1, C), jnp.float32),
    }
    x = jax.random.normal(ks[8], (B, T, C), jnp.float32)

    # seq_tile=64  -> 2 q tiles x 2 KV tiles per batch element: exercises the online-
    #                 softmax accumulation, the causal DMA clamp and diagonal-only mask.
    # ffn_chunk=256 -> 2 hidden-dim chunks: exercises the chunked FFN fori_loop.
    out = transformer_block(x, params, n_head, seq_tile=64, ffn_chunk=256)
    out = jax.block_until_ready(out)

    ref = reference_block(x, params, n_head)
    # bf16 matmul inputs (f32 accumulation) + approx softmax reciprocal give ~1e-3 level
    # deviations from the pure-f32 reference; 2e-2 comfortably separates that from bugs.
    np.testing.assert_allclose(np.asarray(out), np.asarray(ref), atol=2e-2, rtol=2e-2)

    print("KERNEL_OK")
</pallas_src>

<mosaic_0001>
module attributes {stable_mosaic.version = 11 : i64} {
  func.func @ln_qkv_kernel(%arg0: i32, %arg1: i32, %arg2: memref<1x64x128xf32, #tpu.memory_space<vmem>>, %arg3: memref<1x128xf32, #tpu.memory_space<vmem>>, %arg4: memref<1x128xf32, #tpu.memory_space<vmem>>, %arg5: memref<128x384xbf16, #tpu.memory_space<vmem>>, %arg6: memref<1x384xf32, #tpu.memory_space<vmem>>, %arg7: memref<1x4x64x32xbf16, #tpu.memory_space<vmem>>, %arg8: memref<1x4x64x32xbf16, #tpu.memory_space<vmem>>, %arg9: memref<1x4x64x32xbf16, #tpu.memory_space<vmem>>) attributes {dimension_semantics = [#tpu.dimension_semantics<parallel>, #tpu.dimension_semantics<parallel>], iteration_bounds = array<i64: 2, 2>, scalar_prefetch = 0 : i64, scratch_operands = 0 : i64, tpu.core_type = #tpu.core_type<tc>, window_params = [{transform_indices = @transform_0, window_bounds = array<i64: 1, 64, 128>}, {pipeline_mode = #tpu.pipeline_mode<synchronous>, transform_indices = @transform_1, window_bounds = array<i64: 1, 128>}, {pipeline_mode = #tpu.pipeline_mode<synchronous>, transform_indices = @transform_2, window_bounds = array<i64: 1, 128>}, {pipeline_mode = #tpu.pipeline_mode<synchronous>, transform_indices = @transform_3, window_bounds = array<i64: 128, 384>}, {pipeline_mode = #tpu.pipeline_mode<synchronous>, transform_indices = @transform_4, window_bounds = array<i64: 1, 384>}, {transform_indices = @transform_5, window_bounds = array<i64: 1, 4, 64, 32>}, {transform_indices = @transform_6, window_bounds = array<i64: 1, 4, 64, 32>}, {transform_indices = @transform_7, window_bounds = array<i64: 1, 4, 64, 32>}]} {
    %c0 = arith.constant 0 : index
    %c0_0 = arith.constant 0 : index
    %c0_1 = arith.constant 0 : index
    %0 = vector.load %arg2[%c0, %c0_0, %c0_1] : memref<1x64x128xf32, #tpu.memory_space<vmem>>, vector<1x64x128xf32>
    %1 = vector.shape_cast %0 : vector<1x64x128xf32> to vector<64x128xf32>
    %c0_2 = arith.constant 0 : index
    %c0_3 = arith.constant 0 : index
    %2 = vector.load %arg3[%c0_2, %c0_3] : memref<1x128xf32, #tpu.memory_space<vmem>>, vector<1x128xf32>
    %3 = vector.shape_cast %2 : vector<1x128xf32> to vector<128xf32>
    %c0_4 = arith.constant 0 : index
    %c0_5 = arith.constant 0 : index
    %4 = vector.load %arg4[%c0_4, %c0_5] : memref<1x128xf32, #tpu.memory_space<vmem>>, vector<1x128xf32>
    %5 = vector.shape_cast %4 : vector<1x128xf32> to vector<128xf32>
    %cst = arith.constant dense<0.000000e+00> : vector<64xf32>
    %6 = vector.multi_reduction <add>, %1, %cst [1] : vector<64x128xf32> to vector<64xf32>
    %7 = vector.shape_cast %6 : vector<64xf32> to vector<64x1xf32>
    %cst_6 = arith.constant 1.280000e+02 : f32
    %8 = vector.broadcast %cst_6 : f32 to vector<64x1xf32>
    %9 = arith.divf %7, %8 : vector<64x1xf32>
    %10 = vector.broadcast %9 : vector<64x1xf32> to vector<64x128xf32>
    %11 = arith.subf %1, %10 : vector<64x128xf32>
    %12 = arith.mulf %11, %11 : vector<64x128xf32>
    %cst_7 = arith.constant dense<0.000000e+00> : vector<64xf32>
    %13 = vector.multi_reduction <add>, %12, %cst_7 [1] : vector<64x128xf32> to vector<64xf32>
    %14 = vector.shape_cast %13 : vector<64xf32> to vector<64x1xf32>
    %cst_8 = arith.constant 1.280000e+02 : f32
    %15 = vector.broadcast %cst_8 : f32 to vector<64x1xf32>
    %16 = arith.divf %14, %15 : vector<64x1xf32>
    %17 = vector.broadcast %9 : vector<64x1xf32> to vector<64x128xf32>
    %18 = arith.subf %1, %17 : vector<64x128xf32>
    %cst_9 = arith.constant 9.99999974E-6 : f32
    %19 = vector.broadcast %cst_9 : f32 to vector<64x1xf32>
    %20 = arith.addf %16, %19 : vector<64x1xf32>
    %21 = math.rsqrt %20 : vector<64x1xf32>
    %22 = vector.broadcast %21 : vector<64x1xf32> to vector<64x128xf32>
    %23 = arith.mulf %18, %22 : vector<64x128xf32>
    %24 = vector.shape_cast %3 : vector<128xf32> to vector<1x128xf32>
    %25 = vector.broadcast %24 : vector<1x128xf32> to vector<64x128xf32>
    %26 = arith.mulf %23, %25 : vector<64x128xf32>
    %27 = vector.shape_cast %5 : vector<128xf32> to vector<1x128xf32>
    %28 = vector.broadcast %27 : vector<1x128xf32> to vector<64x128xf32>
    %29 = arith.addf %26, %28 : vector<64x128xf32>
    %30 = arith.truncf %29 : vector<64x128xf32> to vector<64x128xbf16>
    %c0_10 = arith.constant 0 : index
    %c0_11 = arith.constant 0 : index
    %31 = vector.load %arg5[%c0_10, %c0_11] : memref<128x384xbf16, #tpu.memory_space<vmem>>, vector<128x384xbf16>
    %cst_12 = arith.constant dense<0.000000e+00> : vector<64x384xf32>
    %32 = tpu.matmul %30, %31, %cst_12 {dimension_numbers = #tpu.dot_dimension_numbers<[1], [0], [0], [1], [0, 0, 1, 1], [], []>} : vector<64x128xbf16>, vector<128x384xbf16>, vector<64x384xf32> -> vector<64x384xf32>
    %c0_13 = arith.constant 0 : index
    %c0_14 = arith.constant 0 : index
    %33 = vector.load %arg6[%c0_13, %c0_14] : memref<1x384xf32, #tpu.memory_space<vmem>>, vector<1x384xf32>
    %34 = vector.shape_cast %33 : vector<1x384xf32> to vector<384xf32>
    %35 = vector.shape_cast %34 : vector<384xf32> to vector<1x384xf32>
    %36 = vector.broadcast %35 : vector<1x384xf32> to vector<64x384xf32>
    %37 = arith.addf %32, %36 : vector<64x384xf32>
    %38 = vector.extract_strided_slice %37 {offsets = [0, 0], sizes = [64, 32], strides = [1, 1]} : vector<64x384xf32> to vector<64x32xf32>
    %39 = arith.truncf %38 : vector<64x32xf32> to vector<64x32xbf16>
    %c0_15 = arith.constant 0 : index
    %c0_16 = arith.constant 0 : index
    %c0_17 = arith.constant 0 : index
    %c0_18 = arith.constant 0 : index
    %40 = vector.load %arg8[%c0_15, %c0_16, %c0_17, %c0_18] : memref<1x4x64x32xbf16, #tpu.memory_space<vmem>>, vector<1x1x64x32xbf16>
    %41 = vector.shape_cast %40 : vector<1x1x64x32xbf16> to vector<64x32xbf16>
    %42 = vector.shape_cast %39 : vector<64x32xbf16> to vector<1x1x64x32xbf16>
    tpu.vector_store %arg8[%c0_15, %c0_16, %c0_17, %c0_18], %42 {strides = array<i32>} : memref<1x4x64x32xbf16, #tpu.memory_space<vmem>>, vector<1x1x64x32xbf16>,
    %43 = vector.extract_strided_slice %37 {offsets = [0, 128], sizes = [64, 32], strides = [1, 1]} : vector<64x384xf32> to vector<64x32xf32>
    %cst_19 = arith.constant 0.176776692 : f32
    %44 = vector.broadcast %cst_19 : f32 to vector<64x32xf32>
    %45 = arith.mulf %43, %44 : vector<64x32xf32>
    %46 = arith.truncf %45 : vector<64x32xf32> to vector<64x32xbf16>
    %c0_20 = arith.constant 0 : index
    %c0_21 = arith.constant 0 : index
    %c0_22 = arith.constant 0 : index
    %c0_23 = arith.constant 0 : index
    %47 = vector.load %arg7[%c0_20, %c0_21, %c0_22, %c0_23] : memref<1x4x64x32xbf16, #tpu.memory_space<vmem>>, vector<1x1x64x32xbf16>
    %48 = vector.shape_cast %47 : vector<1x1x64x32xbf16> to vector<64x32xbf16>
    %49 = vector.shape_cast %46 : vector<64x32xbf16> to vector<1x1x64x32xbf16>
    tpu.vector_store %arg7[%c0_20, %c0_21, %c0_22, %c0_23], %49 {strides = array<i32>} : memref<1x4x64x32xbf16, #tpu.memory_space<vmem>>, vector<1x1x64x32xbf16>,
    %50 = vector.extract_strided_slice %37 {offsets = [0, 256], sizes = [64, 32], strides = [1, 1]} : vector<64x384xf32> to vector<64x32xf32>
    %51 = arith.truncf %50 : vector<64x32xf32> to vector<64x32xbf16>
    %c0_24 = arith.constant 0 : index
    %c0_25 = arith.constant 0 : index
    %c0_26 = arith.constant 0 : index
    %c0_27 = arith.constant 0 : index
    %52 = vector.load %arg9[%c0_24, %c0_25, %c0_26, %c0_27] : memref<1x4x64x32xbf16, #tpu.memory_space<vmem>>, vector<1x1x64x32xbf16>
    %53 = vector.shape_cast %52 : vector<1x1x64x32xbf16> to vector<64x32xbf16>
    %54 = vector.shape_cast %51 : vector<64x32xbf16> to vector<1x1x64x32xbf16>
    tpu.vector_store %arg9[%c0_24, %c0_25, %c0_26, %c0_27], %54 {strides = array<i32>} : memref<1x4x64x32xbf16, #tpu.memory_space<vmem>>, vector<1x1x64x32xbf16>,
    %55 = vector.extract_strided_slice %37 {offsets = [0, 32], sizes = [64, 32], strides = [1, 1]} : vector<64x384xf32> to vector<64x32xf32>
    %56 = arith.truncf %55 : vector<64x32xf32> to vector<64x32xbf16>
    %c0_28 = arith.constant 0 : index
    %c1 = arith.constant 1 : index
    %c0_29 = arith.constant 0 : index
    %c0_30 = arith.constant 0 : index
    %57 = vector.load %arg8[%c0_28, %c1, %c0_29, %c0_30] : memref<1x4x64x32xbf16, #tpu.memory_space<vmem>>, vector<1x1x64x32xbf16>
    %58 = vector.shape_cast %57 : vector<1x1x64x32xbf16> to vector<64x32xbf16>
    %59 = vector.shape_cast %56 : vector<64x32xbf16> to vector<1x1x64x32xbf16>
    tpu.vector_store %arg8[%c0_28, %c1, %c0_29, %c0_30], %59 {strides = array<i32>} : memref<1x4x64x32xbf16, #tpu.memory_space<vmem>>, vector<1x1x64x32xbf16>,
    %60 = vector.extract_strided_slice %37 {offsets = [0, 160], sizes = [64, 32], strides = [1, 1]} : vector<64x384xf32> to vector<64x32xf32>
    %cst_31 = arith.constant 0.176776692 : f32
    %61 = vector.broadcast %cst_31 : f32 to vector<64x32xf32>
    %62 = arith.mulf %60, %61 : vector<64x32xf32>
    %63 = arith.truncf %62 : vector<64x32xf32> to vector<64x32xbf16>
    %c0_32 = arith.constant 0 : index
    %c1_33 = arith.constant 1 : index
    %c0_34 = arith.constant 0 : index
    %c0_35 = arith.constant 0 : index
    %64 = vector.load %arg7[%c0_32, %c1_33, %c0_34, %c0_35] : memref<1x4x64x32xbf16, #tpu.memory_space<vmem>>, vector<1x1x64x32xbf16>
    %65 = vector.shape_cast %64 : vector<1x1x64x32xbf16> to vector<64x32xbf16>
    %66 = vector.shape_cast %63 : vector<64x32xbf16> to vector<1x1x64x32xbf16>
    tpu.vector_store %arg7[%c0_32, %c1_33, %c0_34, %c0_35], %66 {strides = array<i32>} : memref<1x4x64x32xbf16, #tpu.memory_space<vmem>>, vector<1x1x64x32xbf16>,
    %67 = vector.extract_strided_slice %37 {offsets = [0, 288], sizes = [64, 32], strides = [1, 1]} : vector<64x384xf32> to vector<64x32xf32>
    %68 = arith.truncf %67 : vector<64x32xf32> to vector<64x32xbf16>
    %c0_36 = arith.constant 0 : index
    %c1_37 = arith.constant 1 : index
    %c0_38 = arith.constant 0 : index
    %c0_39 = arith.constant 0 : index
    %69 = vector.load %arg9[%c0_36, %c1_37, %c0_38, %c0_39] : memref<1x4x64x32xbf16, #tpu.memory_space<vmem>>, vector<1x1x64x32xbf16>
    %70 = vector.shape_cast %69 : vector<1x1x64x32xbf16> to vector<64x32xbf16>
    %71 = vector.shape_cast %68 : vector<64x32xbf16> to vector<1x1x64x32xbf16>
    tpu.vector_store %arg9[%c0_36, %c1_37, %c0_38, %c0_39], %71 {strides = array<i32>} : memref<1x4x64x32xbf16, #tpu.memory_space<vmem>>, vector<1x1x64x32xbf16>,
    %72 = vector.extract_strided_slice %37 {offsets = [0, 64], sizes = [64, 32], strides = [1, 1]} : vector<64x384xf32> to vector<64x32xf32>
    %73 = arith.truncf %72 : vector<64x32xf32> to vector<64x32xbf16>
    %c0_40 = arith.constant 0 : index
    %c2 = arith.constant 2 : index
    %c0_41 = arith.constant 0 : index
    %c0_42 = arith.constant 0 : index
    %74 = vector.load %arg8[%c0_40, %c2, %c0_41, %c0_42] : memref<1x4x64x32xbf16, #tpu.memory_space<vmem>>, vector<1x1x64x32xbf16>
    %75 = vector.shape_cast %74 : vector<1x1x64x32xbf16> to vector<64x32xbf16>
    %76 = vector.shape_cast %73 : vector<64x32xbf16> to vector<1x1x64x32xbf16>
    tpu.vector_store %arg8[%c0_40, %c2, %c0_41, %c0_42], %76 {strides = array<i32>} : memref<1x4x64x32xbf16, #tpu.memory_space<vmem>>, vector<1x1x64x32xbf16>,
    %77 = vector.extract_strided_slice %37 {offsets = [0, 192], sizes = [64, 32], strides = [1, 1]} : vector<64x384xf32> to vector<64x32xf32>
    %cst_43 = arith.constant 0.176776692 : f32
    %78 = vector.broadcast %cst_43 : f32 to vector<64x32xf32>
    %79 = arith.mulf %77, %78 : vector<64x32xf32>
    %80 = arith.truncf %79 : vector<64x32xf32> to vector<64x32xbf16>
    %c0_44 = arith.constant 0 : index
    %c2_45 = arith.constant 2 : index
    %c0_46 = arith.constant 0 : index
    %c0_47 = arith.constant 0 : index
    %81 = vector.load %arg7[%c0_44, %c2_45, %c0_46, %c0_47] : memref<1x4x64x32xbf16, #tpu.memory_space<vmem>>, vector<1x1x64x32xbf16>
    %82 = vector.shape_cast %81 : vector<1x1x64x32xbf16> to vector<64x32xbf16>
    %83 = vector.shape_cast %80 : vector<64x32xbf16> to vector<1x1x64x32xbf16>
    tpu.vector_store %arg7[%c0_44, %c2_45, %c0_46, %c0_47], %83 {strides = array<i32>} : memref<1x4x64x32xbf16, #tpu.memory_space<vmem>>, vector<1x1x64x32xbf16>,
    %84 = vector.extract_strided_slice %37 {offsets = [0, 320], sizes = [64, 32], strides = [1, 1]} : vector<64x384xf32> to vector<64x32xf32>
    %85 = arith.truncf %84 : vector<64x32xf32> to vector<64x32xbf16>
    %c0_48 = arith.constant 0 : index
    %c2_49 = arith.constant 2 : index
    %c0_50 = arith.constant 0 : index
    %c0_51 = arith.constant 0 : index
    %86 = vector.load %arg9[%c0_48, %c2_49, %c0_50, %c0_51] : memref<1x4x64x32xbf16, #tpu.memory_space<vmem>>, vector<1x1x64x32xbf16>
    %87 = vector.shape_cast %86 : vector<1x1x64x32xbf16> to vector<64x32xbf16>
    %88 = vector.shape_cast %85 : vector<64x32xbf16> to vector<1x1x64x32xbf16>
    tpu.vector_store %arg9[%c0_48, %c2_49, %c0_50, %c0_51], %88 {strides = array<i32>} : memref<1x4x64x32xbf16, #tpu.memory_space<vmem>>, vector<1x1x64x32xbf16>,
    %89 = vector.extract_strided_slice %37 {offsets = [0, 96], sizes = [64, 32], strides = [1, 1]} : vector<64x384xf32> to vector<64x32xf32>
    %90 = arith.truncf %89 : vector<64x32xf32> to vector<64x32xbf16>
    %c0_52 = arith.constant 0 : index
    %c3 = arith.constant 3 : index
    %c0_53 = arith.constant 0 : index
    %c0_54 = arith.constant 0 : index
    %91 = vector.load %arg8[%c0_52, %c3, %c0_53, %c0_54] : memref<1x4x64x32xbf16, #tpu.memory_space<vmem>>, vector<1x1x64x32xbf16>
    %92 = vector.shape_cast %91 : vector<1x1x64x32xbf16> to vector<64x32xbf16>
    %93 = vector.shape_cast %90 : vector<64x32xbf16> to vector<1x1x64x32xbf16>
    tpu.vector_store %arg8[%c0_52, %c3, %c0_53, %c0_54], %93 {strides = array<i32>} : memref<1x4x64x32xbf16, #tpu.memory_space<vmem>>, vector<1x1x64x32xbf16>,
    %94 = vector.extract_strided_slice %37 {offsets = [0, 224], sizes = [64, 32], strides = [1, 1]} : vector<64x384xf32> to vector<64x32xf32>
    %cst_55 = arith.constant 0.176776692 : f32
    %95 = vector.broadcast %cst_55 : f32 to vector<64x32xf32>
    %96 = arith.mulf %94, %95 : vector<64x32xf32>
    %97 = arith.truncf %96 : vector<64x32xf32> to vector<64x32xbf16>
    %c0_56 = arith.constant 0 : index
    %c3_57 = arith.constant 3 : index
    %c0_58 = arith.constant 0 : index
    %c0_59 = arith.constant 0 : index
    %98 = vector.load %arg7[%c0_56, %c3_57, %c0_58, %c0_59] : memref<1x4x64x32xbf16, #tpu.memory_space<vmem>>, vector<1x1x64x32xbf16>
    %99 = vector.shape_cast %98 : vector<1x1x64x32xbf16> to vector<64x32xbf16>
    %100 = vector.shape_cast %97 : vector<64x32xbf16> to vector<1x1x64x32xbf16>
    tpu.vector_store %arg7[%c0_56, %c3_57, %c0_58, %c0_59], %100 {strides = array<i32>} : memref<1x4x64x32xbf16, #tpu.memory_space<vmem>>, vector<1x1x64x32xbf16>,
    %101 = vector.extract_strided_slice %37 {offsets = [0, 352], sizes = [64, 32], strides = [1, 1]} : vector<64x384xf32> to vector<64x32xf32>
    %102 = arith.truncf %101 : vector<64x32xf32> to vector<64x32xbf16>
    %c0_60 = arith.constant 0 : index
    %c3_61 = arith.constant 3 : index
    %c0_62 = arith.constant 0 : index
    %c0_63 = arith.constant 0 : index
    %103 = vector.load %arg9[%c0_60, %c3_61, %c0_62, %c0_63] : memref<1x4x64x32xbf16, #tpu.memory_space<vmem>>, vector<1x1x64x32xbf16>
    %104 = vector.shape_cast %103 : vector<1x1x64x32xbf16> to vector<64x32xbf16>
    %105 = vector.shape_cast %102 : vector<64x32xbf16> to vector<1x1x64x32xbf16>
    tpu.vector_store %arg9[%c0_60, %c3_61, %c0_62, %c0_63], %105 {strides = array<i32>} : memref<1x4x64x32xbf16, #tpu.memory_space<vmem>>, vector<1x1x64x32xbf16>,
    return
  }
  func.func @transform_0(%arg0: i32, %arg1: i32) -> (i32, i32, i32) {
    %c0_i32 = arith.constant 0 : i32
    %c0_i32_0 = arith.constant 0 : i32
    return %arg0, %arg1, %c0_i32 : i32, i32, i32
  }
  func.func @transform_1(%arg0: i32, %arg1: i32) -> (i32, i32) {
    %c0_i32 = arith.constant 0 : i32
    %c0_i32_0 = arith.constant 0 : i32
    %c0_i32_1 = arith.constant 0 : i32
    return %c0_i32, %c0_i32_0 : i32, i32
  }
  func.func @transform_2(%arg0: i32, %arg1: i32) -> (i32, i32) {
    %c0_i32 = arith.constant 0 : i32
    %c0_i32_0 = arith.constant 0 : i32
    %c0_i32_1 = arith.constant 0 : i32
    return %c0_i32, %c0_i32_0 : i32, i32
  }
  func.func @transform_3(%arg0: i32, %arg1: i32) -> (i32, i32) {
    %c0_i32 = arith.constant 0 : i32
    %c0_i32_0 = arith.constant 0 : i32
    %c0_i32_1 = arith.constant 0 : i32
    return %c0_i32, %c0_i32_0 : i32, i32
  }
  func.func @transform_4(%arg0: i32, %arg1: i32) -> (i32, i32) {
    %c0_i32 = arith.constant 0 : i32
    %c0_i32_0 = arith.constant 0 : i32
    %c0_i32_1 = arith.constant 0 : i32
    return %c0_i32, %c0_i32_0 : i32, i32
  }
  func.func @transform_5(%arg0: i32, %arg1: i32) -> (i32, i32, i32, i32) {
    %c0_i32 = arith.constant 0 : i32
    %c0_i32_0 = arith.constant 0 : i32
    %c0_i32_1 = arith.constant 0 : i32
    return %arg0, %c0_i32, %arg1, %c0_i32_0 : i32, i32, i32, i32
  }
  func.func @transform_6(%arg0: i32, %arg1: i32) -> (i32, i32, i32, i32) {
    %c0_i32 = arith.constant 0 : i32
    %c0_i32_0 = arith.constant 0 : i32
    %c0_i32_1 = arith.constant 0 : i32
    return %arg0, %c0_i32, %arg1, %c0_i32_0 : i32, i32, i32, i32
  }
  func.func @transform_7(%arg0: i32, %arg1: i32) -> (i32, i32, i32, i32) {
    %c0_i32 = arith.constant 0 : i32
    %c0_i32_0 = arith.constant 0 : i32
    %c0_i32_1 = arith.constant 0 : i32
    return %arg0, %c0_i32, %arg1, %c0_i32_0 : i32, i32, i32, i32
  }
}

</mosaic_0001>

<bundles_post_ra>
// kernel: tpu_custom_call.1
= control target key start
LH: loop header
LB: loop body
LE: loop exit
PB: predicated region body
PF: predicated region fallthrough
CT: control target
= control target key end

     0   :  { %s3183_s0 = inlined_call_operand.hbm [shape: f32[2,128,128], index: 0, kind: input, shape index: {}]   ;;  %s3184_s1 = inlined_call_operand.vmem [shape: f32[1,128], index: 1, kind: input, shape index: {}]   ;;  %s3185_s2 = inlined_call_operand.vmem [shape: f32[1,128], index: 2, kind: input, shape index: {}]   ;;  %s3186_s3 = inlined_call_operand.hbm [shape: bf16[128,384], index: 3, kind: input, shape index: {}]   ;;  %s3187_s4 = inlined_call_operand.vmem [shape: f32[1,384], index: 4, kind: input, shape index: {}]   ;;  %s3188_s5 = inlined_call_operand.vmem [shape: bf16[2,4,128,32], index: 5, kind: output, shape index: {0}]   ;;  %s3189_s6 = inlined_call_operand.vmem [shape: bf16[2,4,128,32], index: 6, kind: output, shape index: {1}]   ;;  %s3190_s7 = inlined_call_operand.vmem [shape: bf16[2,4,128,32], index: 7, kind: output, shape index: {2}]  }
   0x1   :  { %3196 = sst [smem:[#allocation14_spill]] %s3186_s3 }
   0x2   :  { %3197 = sst [smem:[#allocation15_spill]] %s3188_s5 }
   0x3   :  { %3198 = sst [smem:[#allocation16_spill]] %s3189_s6 }
   0x4   :  { %3199 = sst [smem:[#allocation17_spill]] %s3190_s7 }
   0x5   :  { %13 = vsyncpa [#allocation3], 0 }
   0x6   :  { %15 = vsyncpa [#allocation3 + $0x1], 0 }
   0x7   :  { %16 = vsyncpa [#allocation5], 0  ;;  %s2425_s24 = smov 0   ;;  %s2427_s25 = smov 0  }
   0x8   :  { %s2429_s26 = smov 0   ;;  %s2431_s27 = smov 0  }
   0x9   :  { %s2433_s28 = smov 0   ;;  %s2435_s29 = smov 0  }
   0xa   :  { %s2437_s30 = smov 0   ;;  %s2439_s8 = smov 0  }
   0xb LB: > { %3200 = sst [smem:[#allocation11_spill]] %s2357_s27  ;;  %s1896_s9 = sadd.s32 4294967295, %s2373_s8   ;;  %s2373_s8 = sphi %s2439_s8, %s22_s8   ;;  %s2369_s30 = sphi %s2437_s30, %s3232_s30   ;;  %s2365_s29 = sphi %s2435_s29, %s3231_s29   ;;  %s2361_s28 = sphi %s2433_s28, %s3230_s28   ;;  %s2357_s27 = sphi %s2431_s27, %s3229_s27   ;;  %s2353_s26 = sphi %s2429_s26, %s3228_s26   ;;  %s2349_s25 = sphi %s2427_s25, %s3227_s25   ;;  %s2345_s24 = sphi %s2425_s24, %s3226_s24  }
   0xc   : > { %3201 = sst [smem:[#allocation12_spill]] %s2361_s28  ;;  %p56_p0 = scmp.ne.s32.totalorder %s2349_s25, %s2345_s24 }
   0xd   : > { %p2465_p1 = scmp.eq.s32.totalorder %s1896_s9, 0  ;;  %p2469_p2 = scmp.eq.s32.totalorder %s1896_s9, 3 }
   0xe   : > { %p1898_p3 = scmp.ge.s32.totalorder %s2373_s8, 1  ;;  %p235_p4 = scmp.lt.s32.totalorder %s2373_s8, 5 }
   0xf   : > { %s3202_s10 = scalar_select %p2465_p1, 1, 0 }
  0x10   : > { %s3203_s11 = scalar_select %p2469_p2, 1, 0 }
  0x11   : > { %p2477_p5 = por %p2465_p1, %p56_p0  ;;  %p2481_p6 = pnand %p1898_p3, %p235_p4 }
  0x12   : > { %s2375_s14 = smov [#allocation4]   ;;  %s3207_s3 = sld [smem:[#allocation14_spill]] }
  0x13   : > { %s3204_s12 = scalar_select %p2477_p5, 1, 0 }
  0x14   : > { %s3205_s13 = scalar_select %p2481_p6, 1, 0 }
  0x15   : > { %s253_s15 = sshll.u32 %s2375_s14, 4  ;;  %p2113_p7 = pneg %p2481_p6  ;;  %s254_s15 = int_to_ptr.vmem [resolvable:$true] %s253_s15 }
  0x17   : > { %p2489_p8 = pnand %p2113_p7, %p2465_p1 }
  0x18   : > { %s2245_s19 = scalar_lea.hbm %s3207_s3, 3072 }
  0x19   : > { %p2246_p9 = scmp.ne.s32.totalorder %s3207_s3, %s2245_s19  ;;  %p2247_p10 = pneg %p2489_p8 }
  0x1a   : > { %p2252_p13 = scmp.lt.u32.totalorder %s2245_s19, %s3207_s3 }
  0x1b   : > { %p2248_p11 = pnand %p2247_p10, %p2246_p9 }
  0x1d   : > { %p2249_p12 = pneg %p2248_p11 }
  0x1f   : > { %p2254_p0 = pnand %p2252_p13, %p2249_p12 }
  0x21   : > { %2257 = shalt.err (!%p2254_p0)
}
  0x22   : > { %s2258_s24 = scalar_lea.vmem %s254_s15, 3072  ;;  %p2266_p1 = scmp.lt.s32.totalorder %s254_s15, %s254_s15 }
  0x23   : > { %p2259_p3 = scmp.ne.s32.totalorder %s254_s15, %s2258_s24  ;;  %p2267_p5 = scmp.lt.s32.totalorder %s2258_s24, %s2258_s24 }
  0x25   : > { %p2261_p4 = pnand %p2259_p3, %p2247_p10  ;;  %p2268_p6 = por %p2267_p5, %p2266_p1 }
  0x27   : > { %p2262_p7 = pneg %p2261_p4 }
  0x29   : > { %p2269_p2 = pnand %p2268_p6, %p2262_p7 }
  0x2b   : > { %2272 = shalt.err (!%p2269_p2)
}
  0x2c   : > { %s2376_s9 = smov 192   ;;  %s2377_s14 = smov 12  }
  0x2d   : > { %2116 = dma.hbm_to_vmem [thread:$0]  (!%p2489_p8), %s3207_s3, 3072, %s254_s15, [#allocation5], %s2376_s9, %s2376_s9, %s2377_s14  }
  0x2e   : > { %s31_s19 = sadd.s32 1, %s2365_s29  ;;  %s34_s20 = sadd.s32 1, %s2369_s30 }
  0x2f   : > { %p32_p1 = scmp.ge.s32.totalorder %s31_s19, 2  ;;  %s43_s21 = sadd.s32 1, %s2353_s26 }
  0x30   : > { %p50_p2 = scmp.ne.s32.totalorder %s2353_s26, %s2349_s25  ;;  %p51_p5 = scmp.eq.s32.totalorder %s2373_s8, 0 }
  0x31   : > { %s3234_s19 = smov (%p32_p1, %s31_s19), 0  ;;  %s3236_s20 = smov (!%p32_p1, %s34_s20), %s2369_s30 }
  0x32   : > { %3208 = sst [smem:[#allocation13_spill]] %s3234_s19  ;;  %s39_s22 = ssub.s32 %s2365_s29, %s3234_s19 }
  0x33   : > { %p2520_p6 = por %p51_p5, %p50_p2  ;;  %p36_p8 = scmp.ge.s32.totalorder %s3236_s20, 2 }
  0x34   : > { %p3210_p9 = scmp.ne.s32.totalorder %s3203_s11, 0  ;;  %p2122_p11 = scmp.lt.s32.totalorder %s2373_s8, 4 }
  0x35   : > { %s270_s23 = sand.u32 1, %s2353_s26   ;;  %s3238_s20 = smov (%p36_p8, %s3236_s20), 0 }
  0x36   : > { %p2526_p10 = por %p3210_p9, %p50_p2  ;;  %s1901_s24 = sshll.u32 %s270_s23, 6 }
  0x37   : > { %s38_s9 = ssub.s32 %s2369_s30, %s3238_s20  ;;  %s1902_s17 = sshll.u32 %s2365_s29, 3 }
  0x38   : > { %s40_s14 = sor.u32 %s39_s22, %s38_s9  ;;  %s1903_s18 = sshll.u32 %s2369_s30, 4 }
  0x39   : > { %p41_p12 = scmp.eq.s32.totalorder %s40_s14, 0  ;;  %s280_s3 = sadd.s32 %s1903_s18, %s1902_s17 }
  0x3a   : > { %s274_s19 = scalar_lea.vmem [#allocation2], %s1901_s24  ;;  %s1904_s6 = sshll.u32 %s280_s3, 7 }
  0x3b   : > { %s283_s11 = sshll.u32 %s274_s19, 4  ;;  %s2546_s27 = scalar_lea.hbm %s3183_s0, %s1904_s6  ;;  %s2541_s11 = int_to_ptr.vmem [resolvable:$true] %s283_s11 }
  0x3c   : > { %s2539_s7 = scalar_select %p41_p12, %s2353_s26, %s43_s21  }
  0x3d   : > { %p2552_p13 = pnand %p2122_p11, %p2520_p6  ;;  %s2556_s3 = scalar_lea.sflag [#allocation3], %s270_s23 }
  0x3e   : > { %s2273_s19 = scalar_lea.hbm %s2546_s27, 1024  ;;  %s2278_s28 = scalar_lea.hbm %s3183_s0, 4096 }
  0x3f   : > { %p2274_p0 = scmp.ne.s32.totalorder %s2546_s27, %s2273_s19  ;;  %p2275_p3 = pneg %p2552_p13 }
  0x40   : > { %p2279_p1 = scmp.lt.u32.totalorder %s2546_s27, %s3183_s0  ;;  %p2280_p2 = scmp.lt.u32.totalorder %s2278_s28, %s2273_s19 }
  0x41   : > { %p2276_p4 = pnand %p2275_p3, %p2274_p0  ;;  %p2282_p6 = scmp.lt.u32.totalorder %s2273_s19, %s2546_s27 }
  0x42   : > { %p2281_p5 = por %p2280_p2, %p2279_p1 }
  0x43   : > { %p2277_p7 = pneg %p2276_p4 }
  0x44   : > { %p2283_p8 = por %p2282_p6, %p2281_p5 }
  0x46   : > { %p2284_p9 = pnand %p2283_p8, %p2277_p7 }
  0x48   : > { %2287 = shalt.err (!%p2284_p9)
}
  0x49   : > { %s2288_s23 = scalar_lea.vmem %s2541_s11, 1024  ;;  %s2378_s24 = smov [#allocation2]  }
  0x4a   : > { %p2289_p11 = scmp.ne.s32.totalorder %s2541_s11, %s2288_s23  ;;  %s2293_s9 = sshll.u32 %s2378_s24, 4  ;;  %s2294_s9 = int_to_ptr.vmem [resolvable:$false] %s2293_s9 }
  0x4b   : > { %s2295_s14 = scalar_lea.vmem %s2294_s9, 2048  ;;  %p2296_p4 = scmp.lt.s32.totalorder %s2541_s11, %s2294_s9 }
  0x4c   : > { %p2291_p12 = pnand %p2289_p11, %p2275_p3  ;;  %p2297_p1 = scmp.lt.s32.totalorder %s2295_s14, %s2288_s23 }
  0x4e   : > { %p2292_p0 = pneg %p2291_p12  ;;  %p2298_p2 = por %p2297_p1, %p2296_p4 }
  0x50   : > { %p2299_p5 = pnand %p2298_p2, %p2292_p0 }
  0x52   : > { %2302 = shalt.err (!%p2299_p5)
}
  0x53   : > { %s2379_s17 = smov 128   ;;  %s2380_s18 = smov 8  }
  0x54   : > { %2120 = dma.hbm_to_vmem [thread:$0]  (!%p2552_p13), %s2546_s27, 1024, %s2541_s11, %s2556_s3, %s2379_s17, %s2379_s17, %s2380_s18  }
  0x55   : > { %p3213_p3 = scmp.ne.s32.totalorder %s3205_s13, 0 }
  0x56   : > { %s2587_s19 = sand.u32 (!%p3213_p3), 1, %s2349_s25   ;;  %p3214_p7 = scmp.ne.s32.totalorder (!%p3213_p3), %s3204_s12, 0 }
  0x57   : > { %295 = sbr.rel (%p3213_p3) target bundleno = 936 (0x3a8), region = 40  ;;  %s1906_s5 = sshll.u32 (!%p3213_p3), %s2587_s19, 6 }
  0x58   : > { %s298_s6 = scalar_lea.sflag (!%p3213_p3), [#allocation3], %s2587_s19  ;;  %s301_s28 = scalar_lea.vmem (!%p3213_p3), [#allocation2], %s1906_s5 }
  0x5e   : > { %2336 = dma.done.wait (%p3214_p7), %s298_s6, 1024  }
  0x5f   : > { %2338 = vsyncadd (%p3214_p7), %s298_s6, 4294966272  ;;  %p3215_p6 = scmp.ne.s32.totalorder %s3202_s10, 0 }
  0x61   : > { %2340 = dma.done.wait (%p3215_p6), [#allocation5], 3072  }
  0x62   : > { %2342 = vsyncadd (%p3215_p6), [#allocation5], 4294964224  ;;  %v348_v0 = vld [vmem:[%s301_s28] sm:$0xff]  ;;  %v350_v1 = vld [vmem:[%s301_s28 + $0x10] sm:$0xff]  ;;  %v2381_v63 = vmov 0   ;;  %s2657_s3 = sshll.u32 %s2587_s19, 7 }
  0x63   : > { %358 = vadd.xlane.f32.xlu0 %v348_v0  ;;  %362 = vadd.xlane.f32.xlu1 %v350_v1  ;;  %v349_v2 = vld [vmem:[%s301_s28 + $0x8] sm:$0xff]  ;;  %v351_v3 = vld [vmem:[%s301_s28 + $0x18] sm:$0xff]  ;;  %v352_v4 = vld [vmem:[%s301_s28 + $0x20] sm:$0xff]  ;;  %vm826_vm0 = vcmask 257024   ;;  %s2666_s21 = scalar_lea.vmem [#allocation7], %s2657_s3  ;;  %s2382_s16 = smov 96  }
  0x64   : > { %v353_v5 = vld [vmem:[%s301_s28 + $0x28] sm:$0xff]  ;;  %v354_v6 = vld [vmem:[%s301_s28 + $0x30] sm:$0xff]  ;;  %v355_v7 = vld [vmem:[%s301_s28 + $0x38] sm:$0xff]  ;;  %688 = vmatprep.mubr.bf16.mxu0 %v2381_v63  ;;  %s2682_s23 = scalar_lea.vmem [#allocation6], %s2657_s3  ;;  %s2693_s24 = scalar_lea.vmem [#allocation8], %s2657_s3 }
  0x65   : > { %v2197_v8 = vld [vmem:[#allocation4 + $0x4] ss:$12 sps:$4 sm:$0xff]   ;;  %v2199_v9 = vld [vmem:[#allocation4] ss:$12 sps:$4 sm:$0xff]   ;;  %v2200_v10 = vld [vmem:[#allocation4 + $0x1c] ss:$12 sps:$4 sm:$0xff]  }
  0x66   : > { %v2202_v11 = vld [vmem:[#allocation4 + $0x8] ss:$12 sps:$4 sm:$0xff]   ;;  %656 = vmatprep.subr.bf16.mxu0 %v2197_v8  ;;  %v2203_v44 = vld [vmem:[#allocation4 + $0x18] ss:$12 sps:$4 sm:$0xff]   ;;  %v2206_v46 = vld [vmem:[#allocation4 + $0x20] ss:$12 sps:$4 sm:$0xff]  }
  0x67   : > { %360 = vadd.xlane.f32.xlu0 %v349_v2  ;;  %364 = vadd.xlane.f32.xlu1 %v351_v3  ;;  %v2204_v45 = vld [vmem:[#allocation4 + $0x34] ss:$12 sps:$4 sm:$0xff]   ;;  %v2207_v47 = vld [vmem:[#allocation4 + $0x30] ss:$12 sps:$4 sm:$0xff]   ;;  %v2208_v48 = vld [vmem:[#allocation4 + $0x4c] ss:$12 sps:$4 sm:$0xff]  }
  0x68   : > { %657 = vmatpush1.bf16.msra.mxu0 %v2199_v9  ;;  %2083 = vmatprep.subr.bf16.mxu1 %v2202_v11  ;;  %v2210_v49 = vld [vmem:[#allocation4 + $0x38] ss:$12 sps:$4 sm:$0xff]   ;;  %v2211_v50 = vld [vmem:[#allocation4 + $0x48] ss:$12 sps:$4 sm:$0xff]   ;;  %v2214_v52 = vld [vmem:[#allocation4 + $0x50] ss:$12 sps:$4 sm:$0xff]  }
  0x69   : > { %658 = vmatprep.subr.bf16.mxu0 %v2200_v10  ;;  %2084 = vmatpush3.bf16.msra.mxu1 %v2202_v11  ;;  %v2212_v51 = vld [vmem:[#allocation4 + $0x64] ss:$12 sps:$4 sm:$0xff]   ;;  %v2215_v53 = vld [vmem:[#allocation4 + $0x60] ss:$12 sps:$4 sm:$0xff]   ;;  %v2216_v54 = vld [vmem:[#allocation4 + $0x7c] ss:$12 sps:$4 sm:$0xff]  }
  0x6a   : > { %2085 = vmatprep.subr.bf16.mxu1 %v2206_v46  ;;  %v2218_v55 = vld [vmem:[#allocation4 + $0x68] ss:$12 sps:$4 sm:$0xff]   ;;  %v2219_v56 = vld [vmem:[#allocation4 + $0x78] ss:$12 sps:$4 sm:$0xff]   ;;  %v2222_v58 = vld [vmem:[#allocation4 + $0x80] ss:$12 sps:$4 sm:$0xff]  }
  0x6b   : > { %366 = vadd.xlane.f32.xlu0 %v352_v4  ;;  %368 = vadd.xlane.f32.xlu1 %v353_v5  ;;  %v2220_v57 = vld [vmem:[#allocation4 + $0x94] ss:$12 sps:$4 sm:$0xff]   ;;  %v2223_v59 = vld [vmem:[#allocation4 + $0x90] ss:$12 sps:$4 sm:$0xff]   ;;  %v2224_v60 = vld [vmem:[#allocation4 + $0xac] ss:$12 sps:$4 sm:$0xff]  }
  0x6c   : > { %659 = vmatpush1.bf16.msra.mxu0 %v2203_v44  ;;  %v2226_v61 = vld [vmem:[#allocation4 + $0x98] ss:$12 sps:$4 sm:$0xff]   ;;  %v2227_v62 = vld [vmem:[#allocation4 + $0xa8] ss:$12 sps:$4 sm:$0xff]   ;;  %s2383_s9 = smov 64   ;;  %s2384_s14 = smov 32  }
  0x6d   : > { %660 = vmatprep.subr.bf16.mxu0 %v2204_v45  ;;  %2086 = vmatpush3.bf16.msra.mxu1 %v2206_v46  ;;  %s3216_s17 = sld [smem:[#allocation11_spill]] (%p2526_p10)  ;;  %s3217_s18 = sld [smem:[#allocation12_spill]] (%p2526_p10) }
  0x6e   : > { %2087 = vmatprep.subr.bf16.mxu1 %v2210_v49  ;;  %s3218_s12 = sld [smem:[#allocation15_spill]] (%p2526_p10) }
  0x6f   : > { %370 = vadd.xlane.f32.xlu0 %v354_v6  ;;  %372 = vadd.xlane.f32.xlu1 %v355_v7 }
  0x70   : > { %661 = vmatpush1.bf16.msra.mxu0 %v2207_v47 }
  0x71   : > { %662 = vmatprep.subr.bf16.mxu0 %v2208_v48  ;;  %2088 = vmatpush3.bf16.msra.mxu1 %v2210_v49 }
  0x72   : > { %2089 = vmatprep.subr.bf16.mxu1 %v2214_v52 }
  0x73   : > { %s2036_s19 = sshll.u32 (%p2526_p10), %s3216_s17, 3  ;;  %s2037_s5 = sshll.u32 (%p2526_p10), %s3217_s18, 6 }
  0x74   : > { %663 = vmatpush1.bf16.msra.mxu0 %v2211_v50  ;;  %s1237_s6 = sadd.s32 (%p2526_p10), %s2037_s5, %s2036_s19 }
  0x75   : > { %664 = vmatprep.subr.bf16.mxu0 %v2212_v51  ;;  %2090 = vmatpush3.bf16.msra.mxu1 %v2214_v52  ;;  %s2038_s28 = sshll.u32 (%p2526_p10), %s1237_s6, 2 }
  0x76   : > { %2091 = vmatprep.subr.bf16.mxu1 %v2218_v55  ;;  %s1239_s13 = scalar_lea.vmem (%p2526_p10), %s3218_s12, %s2038_s28 }
  0x78   : > { %665 = vmatpush1.bf16.msra.mxu0 %v2215_v53 }
  0x79   : > { %666 = vmatprep.subr.bf16.mxu0 %v2216_v54  ;;  %2092 = vmatpush3.bf16.msra.mxu1 %v2218_v55 }
  0x7a   : > { %2093 = vmatprep.subr.bf16.mxu1 %v2222_v58 }
  0x7c   : > { %667 = vmatpush1.bf16.msra.mxu0 %v2219_v56 }
  0x7d   : > { %668 = vmatprep.subr.bf16.mxu0 %v2220_v57  ;;  %2094 = vmatpush3.bf16.msra.mxu1 %v2222_v58 }
  0x7e   : > { %2095 = vmatprep.subr.bf16.mxu1 %v2226_v61 }
  0x80   : > { %669 = vmatpush1.bf16.msra.mxu0 %v2223_v59 }
  0x81   : > { %670 = vmatprep.subr.bf16.mxu0 %v2224_v60  ;;  %2096 = vmatpush3.bf16.msra.mxu1 %v2226_v61 }
  0x84   : > { %671 = vmatpush1.bf16.msra.mxu0 %v2227_v62 }
  0xf0   : > { %v359_v12 = vpop.xlane.xlu0 %358  ;;  %v363_v13 = vpop.xlane.xlu1 %362 }
  0xf1   : > { %v375_v14 = vmul.f32 0.0078125, %v359_v12  ;;  %v377_v15 = vmul.f32 0.0078125, %v363_v13 }
  0xf3   : > { %v2599_v16 = vsub.f32 %v348_v0, %v375_v14  ;;  %v2601_v17 = vsub.f32 %v350_v1, %v377_v15  ;;  %v2228_v0 = vld [vmem:[#allocation4 + $0xb0] ss:$12 sps:$4 sm:$0xff]  }
  0xf4   : > { %v361_v18 = vpop.xlane.xlu0 %360  ;;  %v365_v19 = vpop.xlane.xlu1 %364  ;;  %2097 = vmatprep.subr.bf16.mxu1 %v2228_v0 }
  0xf5   : > { %v376_v20 = vmul.f32 0.0078125, %v361_v18  ;;  %v391_v21 = vmul.f32 %v2599_v16, %v2599_v16  ;;  %v378_v22 = vmul.f32 0.0078125, %v365_v19  ;;  %v393_v25 = vmul.f32 %v2601_v17, %v2601_v17  ;;  %2098 = vmatpush3.bf16.msra.mxu1 %v2228_v0 }
  0xf7   : > { %v2605_v23 = vsub.f32 %v349_v2, %v376_v20  ;;  %399 = vadd.xlane.f32.xlu0 %v391_v21  ;;  %v2607_v24 = vsub.f32 %v351_v3, %v378_v22 }
  0xf8   : > { %v367_v26 = vpop.xlane.xlu0 %366  ;;  %v369_v27 = vpop.xlane.xlu1 %368 }
  0xf9   : > { %v379_v28 = vmul.f32 0.0078125, %v367_v26  ;;  %v392_v29 = vmul.f32 %v2605_v23, %v2605_v23  ;;  %v380_v30 = vmul.f32 0.0078125, %v369_v27  ;;  %v394_v33 = vmul.f32 %v2607_v24, %v2607_v24 }
  0xfb   : > { %v2613_v31 = vsub.f32 %v352_v4, %v379_v28  ;;  %403 = vadd.xlane.f32.xlu0 %v393_v25  ;;  %401 = vadd.xlane.f32.xlu1 %v392_v29  ;;  %v2615_v32 = vsub.f32 %v353_v5, %v380_v30  ;;  %v1911_v30 = vld [vmem:[%s3184_s1] ss:$0 sm:$0xff] }
  0xfc   : > { %v371_v34 = vpop.xlane.xlu0 %370  ;;  %v373_v35 = vpop.xlane.xlu1 %372 }
  0xfd   : > { %v381_v36 = vmul.f32 0.0078125, %v371_v34  ;;  %v395_v37 = vmul.f32 %v2613_v31, %v2613_v31  ;;  %v382_v38 = vmul.f32 0.0078125, %v373_v35  ;;  %v396_v41 = vmul.f32 %v2615_v32, %v2615_v32 }
  0xff   : > { %v2621_v39 = vsub.f32 %v354_v6, %v381_v36  ;;  %405 = vadd.xlane.f32.xlu1 %v394_v33  ;;  %407 = vadd.xlane.f32.xlu0 %v395_v37  ;;  %v2623_v40 = vsub.f32 %v355_v7, %v382_v38  ;;  %v1912_v38 = vld [vmem:[%s3185_s2] ss:$0 sm:$0xff] }
 0x101   : > { %v397_v42 = vmul.f32 %v2621_v39, %v2621_v39  ;;  %v398_v43 = vmul.f32 %v2623_v40, %v2623_v40 }
 0x103   : > { %409 = vadd.xlane.f32.xlu1 %v396_v41  ;;  %411 = vadd.xlane.f32.xlu0 %v397_v42 }
 0x107   : > { %413 = vadd.xlane.f32.xlu1 %v398_v43 }
 0x184   : > { %v400_v1 = vpop.xlane.xlu0 %399 }
 0x185   : > { %v415_v2 = vmul.f32 0.0078125, %v400_v1 }
 0x187   : > { %v423_v3 = vadd.f32 1e-05, %v415_v2 }
 0x188   : > { %v402_v4 = vpop.xlane.xlu1 %401  ;;  %v404_v5 = vpop.xlane.xlu0 %403 }
 0x189   : > { %2229 = vrsqrt.f32 %v423_v3  ;;  %v416_v6 = vmul.f32 0.0078125, %v402_v4  ;;  %v417_v7 = vmul.f32 0.0078125, %v404_v5 }
 0x18b   : > { %v424_v8 = vadd.f32 1e-05, %v416_v6  ;;  %v425_v9 = vadd.f32 1e-05, %v417_v7 }
 0x18c   : > { %v406_v10 = vpop.xlane.xlu1 %405  ;;  %v408_v11 = vpop.xlane.xlu0 %407 }
 0x18d   : > { %2231 = vrsqrt.f32 %v424_v8  ;;  %v418_v12 = vmul.f32 0.0078125, %v406_v10  ;;  %v419_v13 = vmul.f32 0.0078125, %v408_v11 }
 0x18e   : > { %2233 = vrsqrt.f32 %v425_v9 }
 0x18f   : > { %v426_v14 = vadd.f32 1e-05, %v418_v12  ;;  %v427_v15 = vadd.f32 1e-05, %v419_v13 }
 0x190   : > { %v410_v18 = vpop.xlane.xlu1 %409  ;;  %v412_v19 = vpop.xlane.xlu0 %411 }
 0x191   : > { %2235 = vrsqrt.f32 %v426_v14  ;;  %v420_v20 = vmul.f32 0.0078125, %v410_v18  ;;  %v421_v21 = vmul.f32 0.0078125, %v412_v19 }
 0x192   : > { %2237 = vrsqrt.f32 %v427_v15 }
 0x193   : > { %v2230_v22 = vpop.eup %2229  ;;  %v428_v25 = vadd.f32 1e-05, %v420_v20  ;;  %v429_v26 = vadd.f32 1e-05, %v421_v21 }
 0x194   : > { %v414_v27 = vpop.xlane.xlu1 %413  ;;  %v439_v28 = vmul.f32 %v2230_v22, %v2599_v16 }
 0x195   : > { %2239 = vrsqrt.f32 %v428_v25  ;;  %v422_v29 = vmul.f32 0.0078125, %v414_v27 }
 0x196   : > { %2241 = vrsqrt.f32 %v429_v26  ;;  %v453_v37 = vmul.f32 %v1911_v30, %v439_v28 }
 0x197   : > { %v2232_v33 = vpop.eup %2231  ;;  %v430_v34 = vadd.f32 1e-05, %v422_v29 }
 0x198   : > { %v2234_v35 = vpop.eup %2233  ;;  %v440_v36 = vmul.f32 %v2232_v33, %v2605_v23  ;;  %v467_v45 = vadd.f32 %v1912_v38, %v453_v37 }
 0x199   : > { %2243 = vrsqrt.f32 %v430_v34  ;;  %v441_v16 = vmul.f32 %v2234_v35, %v2601_v17 }
 0x19a   : > { %v454_v41 = vmul.f32 %v1911_v30, %v440_v36 }
 0x19b   : > { %v2236_v42 = vpop.eup %2235  ;;  %v455_v43 = vmul.f32 %v1911_v30, %v441_v16 }
 0x19c   : > { %v2238_v44 = vpop.eup %2237  ;;  %v468_v46 = vadd.f32 %v1912_v38, %v454_v41  ;;  %v442_v47 = vmul.f32 %v2236_v42, %v2607_v24 }
 0x19d   : > { %v443_v48 = vmul.f32 %v2238_v44, %v2613_v31  ;;  %v469_v51 = vadd.f32 %v1912_v38, %v455_v43 }
 0x19e   : > { %v475_v49 = vpack.c.bf16 %v468_v46, %v467_v45  ;;  %v456_v23 = vmul.f32 %v1911_v30, %v442_v47 }
 0x19f   : > { %v2240_v50 = vpop.eup %2239  ;;  %v457_v54 = vmul.f32 %v1911_v30, %v443_v48 }
 0x1a0   : > { %v2242_v52 = vpop.eup %2241  ;;  %689 = vmatmul.mubr.bf16.vlgmr.msra.gmra.mrb[0].mxu0 %v475_v49  ;;  %2099 = vmatprep.mubr.bf16.mxu1 %v475_v49  ;;  %v470_v53 = vadd.f32 %v1912_v38, %v456_v23  ;;  %v444_v17 = vmul.f32 %v2240_v50, %v2615_v32 }
 0x1a1   : > { %698 = vmatprep.mubr.bf16.mxu0 %v2381_v63  ;;  %v445_v55 = vmul.f32 %v2242_v52, %v2621_v39  ;;  %v471_v31 = vadd.f32 %v1912_v38, %v457_v54  ;;  %v513_v39 = vlaneseq }
 0x1a2   : > { %v476_v56 = vpack.c.bf16 %v470_v53, %v469_v51  ;;  %v458_v57 = vmul.f32 %v1911_v30, %v444_v17 }
 0x1a3   : > { %v2244_v24 = vpop.eup %2243  ;;  %v459_v60 = vmul.f32 %v1911_v30, %v445_v55  ;;  %v514_v2 = vshrl.u32 %v513_v39, 7 }
 0x1a4   : > { %2100 = vmatmul.mubr.bf16.vlgmr.msra.gmra.mrb[0].mxu1 %v476_v56  ;;  %v472_v58 = vadd.f32 %v1912_v38, %v458_v57  ;;  %v446_v59 = vmul.f32 %v2244_v24, %v2623_v40  ;;  %v511_v40 = vld [vmem:[%s3187_s4] sm:$0x7] }
 0x1a5   : > { %v473_v0 = vadd.f32 %v1912_v38, %v459_v60  ;;  %v515_v3 = vsub.s32 0, %v514_v2  ;;  %v519_v4 = vsub.s32 1, %v514_v2  ;;  %v523_v6 = vsub.s32 2, %v514_v2 }
 0x1a6   : > { %v477_v61 = vpack.c.bf16 %v472_v58, %v471_v31  ;;  %v460_v62 = vmul.f32 %v1911_v30, %v446_v59 }
 0x1a7   : > { %v2652_v5 = vrot.slane %v511_v40, %v515_v3  ;;  %v2654_v7 = vrot.slane %v511_v40, %v519_v4  ;;  %v2660_v10 = vrot.slane %v511_v40, %v523_v6 }
 0x1a8   : > { %699 = vmatmul.mubr.bf16.gmra.mrb[4].mxu0 %v476_v56  ;;  %2103 = vmatprep.mubr.bf16.mxu1 %v477_v61  ;;  %v474_v32 = vadd.f32 %v1912_v38, %v460_v62 }
 0x1a9   : > { %708 = vmatprep.mubr.bf16.mxu0 %v2381_v63 }
 0x1aa   : > { %v478_v1 = vpack.c.bf16 %v474_v32, %v473_v0 }
 0x1ac   : > { %2104 = vmatmul.mubr.bf16.gmra.mrb[4].mxu1 %v478_v1 }
 0x1b0   : > { %709 = vmatmul.mubr.bf16.gmra.mrb[8].mxu0 %v477_v61 }
 0x1b1   : > { %718 = vmatprep.mubr.bf16.mxu0 %v2381_v63 }
 0x1b8   : > { %719 = vmatmul.mubr.bf16.gmra.mrb[12].mxu0 %v478_v1 }
 0x273   : > { %v690_v8 = vpop.f32.mrb[0].mxu0 }
 0x274   : > { %v691_v63 = vadd.f32 %v690_v8, %v2652_v5  ;;  %v692_v9 = vpop.f32.mrb[1].mxu0 }
 0x275   : > { %v693_v11 = vadd.f32 %v692_v9, %v2654_v7  ;;  %v694_v12 = vpop.f32.mrb[2].mxu0 }
 0x276   : > { %v2047_v13 = vpack.c.bf16 %v691_v63, %v691_v63  ;;  %v695_v14 = vadd.f32 %v694_v12, %v2652_v5  ;;  %v696_v15 = vpop.f32.mrb[3].mxu0 }
 0x277   : > { %v835_v18 = vmul.f32 0.17677669, %v693_v11  ;;  %v697_v19 = vadd.f32 %v696_v15, %v2654_v7  ;;  %v2101_v20 = vpop.f32.mrb[0].mxu1 }
 0x278   : > { %827 = vst.msk [vmem:[%s2666_s21] sm:$0xf] %vm826_vm0, %v2047_v13  ;;  %v2048_v21 = vpack.c.bf16 %v695_v14, %v695_v14  ;;  %v772_v22 = vadd.f32 %v2101_v20, %v2660_v10  ;;  %923 = vrot.lane.b32.xlu0 %v2047_v13, %s2382_s16  ;;  %v763_v25 = vpop.f32.mrb[1].mxu1 }
 0x279   : > { %v2672_v26 = vpack.c.bf16 %v835_v18, %v835_v18  ;;  %v836_v27 = vmul.f32 0.17677669, %v697_v19  ;;  %v764_v28 = vadd.f32 %v763_v25, %v2660_v10  ;;  %v2102_v29 = vpop.f32.mrb[2].mxu1 }
 0x27a   : > { %828 = vst.msk [vmem:[%s2666_s21 + $0x4] sm:$0xf] %vm826_vm0, %v2048_v21  ;;  %v2677_v30 = vpack.c.bf16 %v772_v22, %v772_v22  ;;  %v775_v33 = vadd.f32 %v2102_v29, %v2660_v10  ;;  %925 = vrot.lane.b32.xlu1 %v2048_v21, %s2382_s16  ;;  %v766_v34 = vpop.f32.mrb[3].mxu1 }
 0x27b   : > { %875 = vst.msk [vmem:[%s2682_s23] sm:$0xf] %vm826_vm0, %v2672_v26  ;;  %v2687_v35 = vpack.c.bf16 %v836_v27, %v836_v27  ;;  %v2689_v36 = vpack.c.bf16 %v764_v28, %v764_v28  ;;  %v767_v37 = vadd.f32 %v766_v34, %v2660_v10  ;;  %v700_v38 = vpop.f32.mrb[4].mxu0 }
 0x27c   : > { %917 = vst.msk [vmem:[%s2693_s24 + $0x8] sm:$0xf] %vm826_vm0, %v2677_v30  ;;  %v2698_v16 = vpack.c.bf16 %v775_v33, %v775_v33  ;;  %v701_v41 = vadd.f32 %v700_v38, %v2652_v5  ;;  %1022 = vrot.lane.b32.xlu0 %v2047_v13, %s2383_s9  ;;  %v702_v42 = vpop.f32.mrb[5].mxu0 }
 0x27d   : > { %876 = vst.msk [vmem:[%s2682_s23 + $0x4] sm:$0xf] %vm826_vm0, %v2687_v35  ;;  %915 = vst.msk [vmem:[%s2693_s24] sm:$0xf] %vm826_vm0, %v2689_v36  ;;  %v2708_v43 = vpack.c.bf16 %v767_v37, %v767_v37  ;;  %v703_v44 = vadd.f32 %v702_v42, %v2654_v7  ;;  %v704_v45 = vpop.f32.mrb[6].mxu0 }
 0x27e   : > { %918 = vst.msk [vmem:[%s2693_s24 + $0xc] sm:$0xf] %vm826_vm0, %v2698_v16  ;;  %v2714_v46 = vpack.c.bf16 %v701_v41, %v701_v41  ;;  %v705_v47 = vadd.f32 %v704_v45, %v2652_v5  ;;  %1024 = vrot.lane.b32.xlu1 %v2048_v21, %s2383_s9  ;;  %v706_v48 = vpop.f32.mrb[7].mxu0 }
 0x27f   : > { %916 = vst.msk [vmem:[%s2693_s24 + $0x4] sm:$0xf] %vm826_vm0, %v2708_v43  ;;  %v837_v49 = vmul.f32 0.17677669, %v703_v44  ;;  %v707_v23 = vadd.f32 %v706_v48, %v2654_v7  ;;  %v2105_v50 = vpop.f32.mrb[4].mxu1 }
 0x280   : > { %829 = vst.msk [vmem:[%s2666_s21 + $0x8] sm:$0xf] %vm826_vm0, %v2714_v46  ;;  %v2725_v51 = vpack.c.bf16 %v705_v47, %v705_v47  ;;  %v788_v52 = vadd.f32 %v2105_v50, %v2660_v10  ;;  %1121 = vrot.lane.b32.xlu0 %v2047_v13, %s2384_s14  ;;  %v779_v53 = vpop.f32.mrb[5].mxu1 }
 0x281   : > { %v2729_v17 = vpack.c.bf16 %v837_v49, %v837_v49  ;;  %v838_v54 = vmul.f32 0.17677669, %v707_v23  ;;  %v780_v55 = vadd.f32 %v779_v53, %v2660_v10  ;;  %v2106_v56 = vpop.f32.mrb[6].mxu1 }
 0x282   : > { %830 = vst.msk [vmem:[%s2666_s21 + $0xc] sm:$0xf] %vm826_vm0, %v2725_v51  ;;  %v2735_v57 = vpack.c.bf16 %v788_v52, %v788_v52  ;;  %v791_v24 = vadd.f32 %v2106_v56, %v2660_v10  ;;  %1123 = vrot.lane.b32.xlu1 %v2048_v21, %s2384_s14  ;;  %v782_v31 = vpop.f32.mrb[7].mxu1 }
 0x283   : > { %877 = vst.msk [vmem:[%s2682_s23 + $0x8] sm:$0xf] %vm826_vm0, %v2729_v17  ;;  %v2742_v58 = vpack.c.bf16 %v838_v54, %v838_v54  ;;  %v2744_v59 = vpack.c.bf16 %v780_v55, %v780_v55  ;;  %v783_v60 = vadd.f32 %v782_v31, %v2660_v10  ;;  %v710_v61 = vpop.f32.mrb[8].mxu0 }
 0x284   : > { %921 = vst.msk [vmem:[%s2693_s24 + $0x18] sm:$0xf] %vm826_vm0, %v2735_v57  ;;  %v2750_v62 = vpack.c.bf16 %v791_v24, %v791_v24  ;;  %v711_v0 = vadd.f32 %v710_v61, %v2652_v5  ;;  %993 = vrot.lane.b32.xlu0 %v2677_v30, %s2382_s16  ;;  %v712_v32 = vpop.f32.mrb[9].mxu0 }
 0x285   : > { %878 = vst.msk [vmem:[%s2682_s23 + $0xc] sm:$0xf] %vm826_vm0, %v2742_v58  ;;  %919 = vst.msk [vmem:[%s2693_s24 + $0x10] sm:$0xf] %vm826_vm0, %v2744_v59  ;;  %v2761_v1 = vpack.c.bf16 %v783_v60, %v783_v60  ;;  %v713_v39 = vadd.f32 %v712_v32, %v2654_v7  ;;  %v714_v2 = vpop.f32.mrb[10].mxu0 }
 0x286   : > { %922 = vst.msk [vmem:[%s2693_s24 + $0x1c] sm:$0xf] %vm826_vm0, %v2750_v62  ;;  %v2767_v3 = vpack.c.bf16 %v711_v0, %v711_v0  ;;  %v715_v40 = vadd.f32 %v714_v2, %v2652_v5  ;;  %995 = vrot.lane.b32.xlu1 %v2698_v16, %s2382_s16  ;;  %v716_v4 = vpop.f32.mrb[11].mxu0 }
 0x287   : > { %920 = vst.msk [vmem:[%s2693_s24 + $0x14] sm:$0xf] %vm826_vm0, %v2761_v1  ;;  %v839_v6 = vmul.f32 0.17677669, %v713_v39  ;;  %v717_v8 = vadd.f32 %v716_v4, %v2654_v7 }
 0x288   : > { %831 = vst.msk [vmem:[%s2666_s21 + $0x10] sm:$0xf] %vm826_vm0, %v2767_v3  ;;  %v2779_v63 = vpack.c.bf16 %v715_v40, %v715_v40  ;;  %1092 = vrot.lane.b32.xlu0 %v2677_v30, %s2383_s9 }
 0x289   : > { %v2783_v9 = vpack.c.bf16 %v839_v6, %v839_v6  ;;  %v840_v10 = vmul.f32 0.17677669, %v717_v8 }
 0x28a   : > { %832 = vst.msk [vmem:[%s2666_s21 + $0x14] sm:$0xf] %vm826_vm0, %v2779_v63  ;;  %1094 = vrot.lane.b32.xlu1 %v2698_v16, %s2383_s9 }
 0x28b   : > { %879 = vst.msk [vmem:[%s2682_s23 + $0x10] sm:$0xf] %vm826_vm0, %v2783_v9  ;;  %v2793_v11 = vpack.c.bf16 %v840_v10, %v840_v10  ;;  %v720_v12 = vpop.f32.mrb[12].mxu0 }
 0x28c   : > { %v721_v13 = vadd.f32 %v720_v12, %v2652_v5  ;;  %1191 = vrot.lane.b32.xlu0 %v2677_v30, %s2384_s14  ;;  %v722_v14 = vpop.f32.mrb[13].mxu0 }
 0x28d   : > { %880 = vst.msk [vmem:[%s2682_s23 + $0x14] sm:$0xf] %vm826_vm0, %v2793_v11  ;;  %v723_v15 = vadd.f32 %v722_v14, %v2654_v7  ;;  %v724_v18 = vpop.f32.mrb[14].mxu0 }
 0x28e   : > { %v2802_v19 = vpack.c.bf16 %v721_v13, %v721_v13  ;;  %v725_v20 = vadd.f32 %v724_v18, %v2652_v5  ;;  %1193 = vrot.lane.b32.xlu1 %v2698_v16, %s2384_s14  ;;  %v726_v21 = vpop.f32.mrb[15].mxu0 }
 0x28f   : > { %v841_v22 = vmul.f32 0.17677669, %v723_v15  ;;  %v727_v25 = vadd.f32 %v726_v21, %v2654_v7 }
 0x290   : > { %833 = vst.msk [vmem:[%s2666_s21 + $0x18] sm:$0xf] %vm826_vm0, %v2802_v19  ;;  %v2811_v27 = vpack.c.bf16 %v725_v20, %v725_v20  ;;  %989 = vrot.lane.b32.xlu0 %v2689_v36, %s2382_s16 }
 0x291   : > { %v2815_v28 = vpack.c.bf16 %v841_v22, %v841_v22  ;;  %v842_v29 = vmul.f32 0.17677669, %v727_v25 }
 0x292   : > { %834 = vst.msk [vmem:[%s2666_s21 + $0x1c] sm:$0xf] %vm826_vm0, %v2811_v27  ;;  %991 = vrot.lane.b32.xlu1 %v2708_v43, %s2382_s16 }
 0x293   : > { %881 = vst.msk [vmem:[%s2682_s23 + $0x18] sm:$0xf] %vm826_vm0, %v2815_v28  ;;  %v2825_v5 = vpack.c.bf16 %v842_v29, %v842_v29 }
 0x294   : > { %1088 = vrot.lane.b32.xlu0 %v2689_v36, %s2383_s9 }
 0x295   : > { %882 = vst.msk [vmem:[%s2682_s23 + $0x1c] sm:$0xf] %vm826_vm0, %v2825_v5 }
 0x296   : > { %1090 = vrot.lane.b32.xlu1 %v2708_v43, %s2383_s9 }
 0x298   : > { %1187 = vrot.lane.b32.xlu0 %v2689_v36, %s2384_s14 }
 0x29a   : > { %1189 = vrot.lane.b32.xlu1 %v2708_v43, %s2384_s14 }
 0x29c   : > { %956 = vrot.lane.b32.xlu0 %v2672_v26, %s2382_s16 }
 0x29e   : > { %958 = vrot.lane.b32.xlu1 %v2687_v35, %s2382_s16 }
 0x2a0   : > { %1055 = vrot.lane.b32.xlu0 %v2672_v26, %s2383_s9 }
 0x2a2   : > { %1057 = vrot.lane.b32.xlu1 %v2687_v35, %s2383_s9 }
 0x2a4   : > { %1154 = vrot.lane.b32.xlu0 %v2672_v26, %s2384_s14 }
 0x2a6   : > { %1156 = vrot.lane.b32.xlu1 %v2687_v35, %s2384_s14 }
 0x2a8   : > { %1026 = vrot.lane.b32.xlu0 %v2714_v46, %s2383_s9 }
 0x2aa   : > { %927 = vrot.lane.b32.xlu1 %v2714_v46, %s2382_s16 }
 0x2ac   : > { %1125 = vrot.lane.b32.xlu0 %v2714_v46, %s2384_s14 }
 0x2ae   : > { %929 = vrot.lane.b32.xlu1 %v2725_v51, %s2382_s16 }
 0x2b0   : > { %1001 = vrot.lane.b32.xlu0 %v2735_v57, %s2382_s16 }
 0x2b2   : > { %1028 = vrot.lane.b32.xlu1 %v2725_v51, %s2383_s9 }
 0x2b4   : > { %1100 = vrot.lane.b32.xlu0 %v2735_v57, %s2383_s9 }
 0x2b6   : > { %1127 = vrot.lane.b32.xlu1 %v2725_v51, %s2384_s14 }
 0x2b8   : > { %997 = vrot.lane.b32.xlu0 %v2744_v59, %s2382_s16 }
 0x2ba   : > { %1003 = vrot.lane.b32.xlu1 %v2750_v62, %s2382_s16 }
 0x2bc   : > { %1096 = vrot.lane.b32.xlu0 %v2744_v59, %s2383_s9 }
 0x2be   : > { %1102 = vrot.lane.b32.xlu1 %v2750_v62, %s2383_s9 }
 0x2c0   : > { %1195 = vrot.lane.b32.xlu0 %v2744_v59, %s2384_s14 }
 0x2c2   : > { %999 = vrot.lane.b32.xlu1 %v2761_v1, %s2382_s16 }
 0x2c4   : > { %960 = vrot.lane.b32.xlu0 %v2729_v17, %s2382_s16 }
 0x2c6   : > { %1098 = vrot.lane.b32.xlu1 %v2761_v1, %s2383_s9 }
 0x2c8   : > { %1059 = vrot.lane.b32.xlu0 %v2729_v17, %s2383_s9 }
 0x2ca   : > { %1197 = vrot.lane.b32.xlu1 %v2761_v1, %s2384_s14 }
 0x2cc   : > { %1158 = vrot.lane.b32.xlu0 %v2729_v17, %s2384_s14 }
 0x2ce   : > { %962 = vrot.lane.b32.xlu1 %v2742_v58, %s2382_s16 }
 0x2d0   : > { %931 = vrot.lane.b32.xlu0 %v2767_v3, %s2382_s16 }
 0x2d2   : > { %1061 = vrot.lane.b32.xlu1 %v2742_v58, %s2383_s9 }
 0x2d4   : > { %1030 = vrot.lane.b32.xlu0 %v2767_v3, %s2383_s9 }
 0x2d6   : > { %1160 = vrot.lane.b32.xlu1 %v2742_v58, %s2384_s14 }
 0x2d8   : > { %1129 = vrot.lane.b32.xlu0 %v2767_v3, %s2384_s14 }
 0x2da   : > { %933 = vrot.lane.b32.xlu1 %v2779_v63, %s2382_s16 }
 0x2dc   : > { %964 = vrot.lane.b32.xlu0 %v2783_v9, %s2382_s16 }
 0x2de   : > { %1032 = vrot.lane.b32.xlu1 %v2779_v63, %s2383_s9 }
 0x2e0   : > { %1063 = vrot.lane.b32.xlu0 %v2783_v9, %s2383_s9 }
 0x2e2   : > { %1131 = vrot.lane.b32.xlu1 %v2779_v63, %s2384_s14 }
 0x2e4   : > { %1162 = vrot.lane.b32.xlu0 %v2783_v9, %s2384_s14 }
 0x2e6   : > { %966 = vrot.lane.b32.xlu1 %v2793_v11, %s2382_s16 }
 0x2e8   : > { %935 = vrot.lane.b32.xlu0 %v2802_v19, %s2382_s16 }
 0x2ea   : > { %1065 = vrot.lane.b32.xlu1 %v2793_v11, %s2383_s9  ;;  %v924_v7 = vpop.permute.xlu0 %923 }
 0x2eb   : > { %1961 = vst.msk [vmem:[%s2666_s21 + $0x20] sm:$0xf] %vm826_vm0, %v924_v7 }
 0x2ec   : > { %v926_v26 = vpop.permute.xlu1 %925  ;;  %1034 = vrot.lane.b32.xlu0 %v2802_v19, %s2383_s9 }
 0x2ed   : > { %1962 = vst.msk [vmem:[%s2666_s21 + $0x24] sm:$0xf] %vm826_vm0, %v926_v26 }
 0x2ee   : > { %1164 = vrot.lane.b32.xlu1 %v2793_v11, %s2384_s14  ;;  %v1023_v30 = vpop.permute.xlu0 %1022 }
 0x2ef   : > { %1985 = vst.msk [vmem:[%s2666_s21 + $0x40] sm:$0xf] %vm826_vm0, %v1023_v30 }
 0x2f0   : > { %v1025_v33 = vpop.permute.xlu1 %1024  ;;  %1133 = vrot.lane.b32.xlu0 %v2802_v19, %s2384_s14 }
 0x2f1   : > { %1986 = vst.msk [vmem:[%s2666_s21 + $0x44] sm:$0xf] %vm826_vm0, %v1025_v33 }
 0x2f2   : > { %937 = vrot.lane.b32.xlu1 %v2811_v27, %s2382_s16  ;;  %v1122_v34 = vpop.permute.xlu0 %1121 }
 0x2f3   : > { %2009 = vst.msk [vmem:[%s2666_s21 + $0x60] sm:$0xf] %vm826_vm0, %v1122_v34 }
 0x2f4   : > { %v1124_v35 = vpop.permute.xlu1 %1123  ;;  %968 = vrot.lane.b32.xlu0 %v2815_v28, %s2382_s16 }
 0x2f5   : > { %2010 = vst.msk [vmem:[%s2666_s21 + $0x64] sm:$0xf] %vm826_vm0, %v1124_v35 }
 0x2f6   : > { %1036 = vrot.lane.b32.xlu1 %v2811_v27, %s2383_s9  ;;  %v994_v36 = vpop.permute.xlu0 %993 }
 0x2f7   : > { %1979 = vst.msk [vmem:[%s2693_s24 + $0x28] sm:$0xf] %vm826_vm0, %v994_v36 }
 0x2f8   : > { %v996_v37 = vpop.permute.xlu1 %995  ;;  %1067 = vrot.lane.b32.xlu0 %v2815_v28, %s2383_s9 }
 0x2f9   : > { %1980 = vst.msk [vmem:[%s2693_s24 + $0x2c] sm:$0xf] %vm826_vm0, %v996_v37 }
 0x2fa   : > { %1135 = vrot.lane.b32.xlu1 %v2811_v27, %s2384_s14  ;;  %v1093_v38 = vpop.permute.xlu0 %1092 }
 0x2fb   : > { %2003 = vst.msk [vmem:[%s2693_s24 + $0x48] sm:$0xf] %vm826_vm0, %v1093_v38  ;;  %v1255_v38 = vld [vmem:[%s2682_s23] sm:$0xff] (%p2526_p10)  }
 0x2fc   : > { %v1095_v16 = vpop.permute.xlu1 %1094  ;;  %1166 = vrot.lane.b32.xlu0 %v2815_v28, %s2384_s14  ;;  %1256 = vst [vmem:[%s1239_s13] sm:$0xff] (%p2526_p10), %v1255_v38  }
 0x2fd   : > { %2004 = vst.msk [vmem:[%s2693_s24 + $0x4c] sm:$0xf] %vm826_vm0, %v1095_v16  ;;  %v1259_v16 = vld [vmem:[%s2682_s23 + $0x8] sm:$0xff] (%p2526_p10)  }
 0x2fe   : > { %970 = vrot.lane.b32.xlu1 %v2825_v5, %s2382_s16  ;;  %v1192_v41 = vpop.permute.xlu0 %1191  ;;  %1260 = vst [vmem:[%s1239_s13 + $0x8] sm:$0xff] (%p2526_p10), %v1259_v16  }
 0x2ff   : > { %2027 = vst.msk [vmem:[%s2693_s24 + $0x68] sm:$0xf] %vm826_vm0, %v1192_v41  ;;  %v1263_v41 = vld [vmem:[%s2682_s23 + $0x10] sm:$0xff] (%p2526_p10)  }
 0x300   : > { %v1194_v42 = vpop.permute.xlu1 %1193  ;;  %1199 = vrot.lane.b32.xlu0 %v2735_v57, %s2384_s14  ;;  %1264 = vst [vmem:[%s1239_s13 + $0x10] sm:$0xff] (%p2526_p10), %v1263_v41  }
 0x301   : > { %2028 = vst.msk [vmem:[%s2693_s24 + $0x6c] sm:$0xf] %vm826_vm0, %v1194_v42  ;;  %v1267_v42 = vld [vmem:[%s2682_s23 + $0x18] sm:$0xff] (%p2526_p10)  }
 0x302   : > { %1069 = vrot.lane.b32.xlu1 %v2825_v5, %s2383_s9  ;;  %v990_v43 = vpop.permute.xlu0 %989  ;;  %1268 = vst [vmem:[%s1239_s13 + $0x18] sm:$0xff] (%p2526_p10), %v1267_v42  }
 0x303   : > { %1977 = vst.msk [vmem:[%s2693_s24 + $0x20] sm:$0xf] %vm826_vm0, %v990_v43 }
 0x304   : > { %v992_v44 = vpop.permute.xlu1 %991 }
 0x305   : > { %1978 = vst.msk [vmem:[%s2693_s24 + $0x24] sm:$0xf] %vm826_vm0, %v992_v44 }
 0x306   : > { %1168 = vrot.lane.b32.xlu1 %v2825_v5, %s2384_s14  ;;  %v1089_v45 = vpop.permute.xlu0 %1088 }
 0x307   : > { %2001 = vst.msk [vmem:[%s2693_s24 + $0x40] sm:$0xf] %vm826_vm0, %v1089_v45 }
 0x308   : > { %v1091_v46 = vpop.permute.xlu1 %1090 }
 0x309   : > { %2002 = vst.msk [vmem:[%s2693_s24 + $0x44] sm:$0xf] %vm826_vm0, %v1091_v46 }
 0x30a   : > { %1201 = vrot.lane.b32.xlu1 %v2750_v62, %s2384_s14  ;;  %v1188_v47 = vpop.permute.xlu0 %1187 }
 0x30b   : > { %2025 = vst.msk [vmem:[%s2693_s24 + $0x60] sm:$0xf] %vm826_vm0, %v1188_v47 }
 0x30c   : > { %v1190_v48 = vpop.permute.xlu1 %1189 }
 0x30d   : > { %2026 = vst.msk [vmem:[%s2693_s24 + $0x64] sm:$0xf] %vm826_vm0, %v1190_v48 }
 0x30e   : > { %v957_v49 = vpop.permute.xlu0 %956 }
 0x30f   : > { %1969 = vst.msk [vmem:[%s2682_s23 + $0x20] sm:$0xf] %vm826_vm0, %v957_v49 }
 0x310   : > { %v959_v23 = vpop.permute.xlu1 %958 }
 0x311   : > { %1970 = vst.msk [vmem:[%s2682_s23 + $0x24] sm:$0xf] %vm826_vm0, %v959_v23 }
 0x312   : > { %v1056_v50 = vpop.permute.xlu0 %1055 }
 0x313   : > { %1993 = vst.msk [vmem:[%s2682_s23 + $0x40] sm:$0xf] %vm826_vm0, %v1056_v50 }
 0x314   : > { %v1058_v51 = vpop.permute.xlu1 %1057 }
 0x315   : > { %1994 = vst.msk [vmem:[%s2682_s23 + $0x44] sm:$0xf] %vm826_vm0, %v1058_v51 }
 0x316   : > { %v1155_v52 = vpop.permute.xlu0 %1154 }
 0x317   : > { %2017 = vst.msk [vmem:[%s2682_s23 + $0x60] sm:$0xf] %vm826_vm0, %v1155_v52 }
 0x318   : > { %v1157_v53 = vpop.permute.xlu1 %1156  ;;  %v1271_v43 = vld [vmem:[%s2682_s23 + $0x20] sm:$0xff] (%p2526_p10)  }
 0x319   : > { %2018 = vst.msk [vmem:[%s2682_s23 + $0x64] sm:$0xf] %vm826_vm0, %v1157_v53  ;;  %1272 = vst [vmem:[%s1239_s13 + $0x40] sm:$0xff] (%p2526_p10), %v1271_v43  }
 0x31a   : > { %v1027_v17 = vpop.permute.xlu0 %1026 }
 0x31b   : > { %1987 = vst.msk [vmem:[%s2666_s21 + $0x48] sm:$0xf] %vm826_vm0, %v1027_v17 }
 0x31c   : > { %v928_v54 = vpop.permute.xlu1 %927  ;;  %v1287_v47 = vld [vmem:[%s2682_s23 + $0x40] sm:$0xff] (%p2526_p10)  }
 0x31d   : > { %1963 = vst.msk [vmem:[%s2666_s21 + $0x28] sm:$0xf] %vm826_vm0, %v928_v54  ;;  %1288 = vst [vmem:[%s1239_s13 + $0x80] sm:$0xff] (%p2526_p10), %v1287_v47  }
 0x31e   : > { %v1126_v55 = vpop.permute.xlu0 %1125 }
 0x31f   : > { %2011 = vst.msk [vmem:[%s2666_s21 + $0x68] sm:$0xf] %vm826_vm0, %v1126_v55 }
 0x320   : > { %v930_v56 = vpop.permute.xlu1 %929  ;;  %v1303_v50 = vld [vmem:[%s2682_s23 + $0x60] sm:$0xff] (%p2526_p10)  }
 0x321   : > { %1964 = vst.msk [vmem:[%s2666_s21 + $0x2c] sm:$0xf] %vm826_vm0, %v930_v56  ;;  %1304 = vst [vmem:[%s1239_s13 + $0xc0] sm:$0xff] (%p2526_p10), %v1303_v50  }
 0x322   : > { %v1002_v57 = vpop.permute.xlu0 %1001 }
 0x323   : > { %1983 = vst.msk [vmem:[%s2693_s24 + $0x38] sm:$0xf] %vm826_vm0, %v1002_v57 }
 0x324   : > { %v1029_v24 = vpop.permute.xlu1 %1028 }
 0x325   : > { %1988 = vst.msk [vmem:[%s2666_s21 + $0x4c] sm:$0xf] %vm826_vm0, %v1029_v24 }
 0x326   : > { %v1101_v31 = vpop.permute.xlu0 %1100 }
 0x327   : > { %2007 = vst.msk [vmem:[%s2693_s24 + $0x58] sm:$0xf] %vm826_vm0, %v1101_v31 }
 0x328   : > { %v1128_v58 = vpop.permute.xlu1 %1127 }
 0x329   : > { %2012 = vst.msk [vmem:[%s2666_s21 + $0x6c] sm:$0xf] %vm826_vm0, %v1128_v58 }
 0x32a   : > { %v998_v59 = vpop.permute.xlu0 %997 }
 0x32b   : > { %1981 = vst.msk [vmem:[%s2693_s24 + $0x30] sm:$0xf] %vm826_vm0, %v998_v59 }
 0x32c   : > { %v1004_v60 = vpop.permute.xlu1 %1003 }
 0x32d   : > { %1984 = vst.msk [vmem:[%s2693_s24 + $0x3c] sm:$0xf] %vm826_vm0, %v1004_v60 }
 0x32e   : > { %v1097_v61 = vpop.permute.xlu0 %1096 }
 0x32f   : > { %2005 = vst.msk [vmem:[%s2693_s24 + $0x50] sm:$0xf] %vm826_vm0, %v1097_v61 }
 0x330   : > { %v1103_v62 = vpop.permute.xlu1 %1102 }
 0x331   : > { %2008 = vst.msk [vmem:[%s2693_s24 + $0x5c] sm:$0xf] %vm826_vm0, %v1103_v62 }
 0x332   : > { %v1196_v0 = vpop.permute.xlu0 %1195 }
 0x333   : > { %2029 = vst.msk [vmem:[%s2693_s24 + $0x70] sm:$0xf] %vm826_vm0, %v1196_v0 }
 0x334   : > { %v1000_v32 = vpop.permute.xlu1 %999 }
 0x335   : > { %1982 = vst.msk [vmem:[%s2693_s24 + $0x34] sm:$0xf] %vm826_vm0, %v1000_v32 }
 0x336   : > { %v961_v1 = vpop.permute.xlu0 %960 }
 0x337   : > { %1971 = vst.msk [vmem:[%s2682_s23 + $0x28] sm:$0xf] %vm826_vm0, %v961_v1 }
 0x338   : > { %v1099_v39 = vpop.permute.xlu1 %1098 }
 0x339   : > { %2006 = vst.msk [vmem:[%s2693_s24 + $0x54] sm:$0xf] %vm826_vm0, %v1099_v39 }
 0x33a   : > { %v1060_v2 = vpop.permute.xlu0 %1059 }
 0x33b   : > { %1995 = vst.msk [vmem:[%s2682_s23 + $0x48] sm:$0xf] %vm826_vm0, %v1060_v2 }
 0x33c   : > { %v1198_v3 = vpop.permute.xlu1 %1197 }
 0x33d   : > { %2030 = vst.msk [vmem:[%s2693_s24 + $0x74] sm:$0xf] %vm826_vm0, %v1198_v3 }
 0x33e   : > { %v1159_v40 = vpop.permute.xlu0 %1158 }
 0x33f   : > { %2019 = vst.msk [vmem:[%s2682_s23 + $0x68] sm:$0xf] %vm826_vm0, %v1159_v40 }
 0x340   : > { %v963_v4 = vpop.permute.xlu1 %962 }
 0x341   : > { %1972 = vst.msk [vmem:[%s2682_s23 + $0x2c] sm:$0xf] %vm826_vm0, %v963_v4 }
 0x342   : > { %v932_v6 = vpop.permute.xlu0 %931 }
 0x343   : > { %1965 = vst.msk [vmem:[%s2666_s21 + $0x30] sm:$0xf] %vm826_vm0, %v932_v6 }
 0x344   : > { %v1062_v8 = vpop.permute.xlu1 %1061 }
 0x345   : > { %1996 = vst.msk [vmem:[%s2682_s23 + $0x4c] sm:$0xf] %vm826_vm0, %v1062_v8 }
 0x346   : > { %v1031_v63 = vpop.permute.xlu0 %1030 }
 0x347   : > { %1989 = vst.msk [vmem:[%s2666_s21 + $0x50] sm:$0xf] %vm826_vm0, %v1031_v63 }
 0x348   : > { %v1161_v9 = vpop.permute.xlu1 %1160  ;;  %v1275_v44 = vld [vmem:[%s2682_s23 + $0x28] sm:$0xff] (%p2526_p10)  }
 0x349   : > { %2020 = vst.msk [vmem:[%s2682_s23 + $0x6c] sm:$0xf] %vm826_vm0, %v1161_v9  ;;  %1276 = vst [vmem:[%s1239_s13 + $0x48] sm:$0xff] (%p2526_p10), %v1275_v44  }
 0x34a   : > { %v1130_v10 = vpop.permute.xlu0 %1129 }
 0x34b   : > { %2013 = vst.msk [vmem:[%s2666_s21 + $0x70] sm:$0xf] %vm826_vm0, %v1130_v10 }
 0x34c   : > { %v934_v11 = vpop.permute.xlu1 %933  ;;  %v1291_v48 = vld [vmem:[%s2682_s23 + $0x48] sm:$0xff] (%p2526_p10)  }
 0x34d   : > { %1966 = vst.msk [vmem:[%s2666_s21 + $0x34] sm:$0xf] %vm826_vm0, %v934_v11  ;;  %1292 = vst [vmem:[%s1239_s13 + $0x88] sm:$0xff] (%p2526_p10), %v1291_v48  }
 0x34e   : > { %v965_v12 = vpop.permute.xlu0 %964 }
 0x34f   : > { %1973 = vst.msk [vmem:[%s2682_s23 + $0x30] sm:$0xf] %vm826_vm0, %v965_v12 }
 0x350   : > { %v1033_v13 = vpop.permute.xlu1 %1032  ;;  %v1307_v51 = vld [vmem:[%s2682_s23 + $0x68] sm:$0xff] (%p2526_p10)  }
 0x351   : > { %1990 = vst.msk [vmem:[%s2666_s21 + $0x54] sm:$0xf] %vm826_vm0, %v1033_v13  ;;  %1308 = vst [vmem:[%s1239_s13 + $0xc8] sm:$0xff] (%p2526_p10), %v1307_v51  }
 0x352   : > { %v1064_v14 = vpop.permute.xlu0 %1063 }
 0x353   : > { %1997 = vst.msk [vmem:[%s2682_s23 + $0x50] sm:$0xf] %vm826_vm0, %v1064_v14 }
 0x354   : > { %v1132_v15 = vpop.permute.xlu1 %1131 }
 0x355   : > { %2014 = vst.msk [vmem:[%s2666_s21 + $0x74] sm:$0xf] %vm826_vm0, %v1132_v15 }
 0x356   : > { %v1163_v18 = vpop.permute.xlu0 %1162 }
 0x357   : > { %2021 = vst.msk [vmem:[%s2682_s23 + $0x70] sm:$0xf] %vm826_vm0, %v1163_v18 }
 0x358   : > { %v967_v19 = vpop.permute.xlu1 %966 }
 0x359   : > { %1974 = vst.msk [vmem:[%s2682_s23 + $0x34] sm:$0xf] %vm826_vm0, %v967_v19 }
 0x35a   : > { %v936_v20 = vpop.permute.xlu0 %935 }
 0x35b   : > { %1967 = vst.msk [vmem:[%s2666_s21 + $0x38] sm:$0xf] %vm826_vm0, %v936_v20 }
 0x35c   : > { %v1066_v21 = vpop.permute.xlu1 %1065 }
 0x35d   : > { %1998 = vst.msk [vmem:[%s2682_s23 + $0x54] sm:$0xf] %vm826_vm0, %v1066_v21 }
 0x35e   : > { %v1035_v22 = vpop.permute.xlu0 %1034 }
 0x35f   : > { %1991 = vst.msk [vmem:[%s2666_s21 + $0x58] sm:$0xf] %vm826_vm0, %v1035_v22 }
 0x360   : > { %v1165_v25 = vpop.permute.xlu1 %1164  ;;  %v1279_v45 = vld [vmem:[%s2682_s23 + $0x30] sm:$0xff] (%p2526_p10)  }
 0x361   : > { %2022 = vst.msk [vmem:[%s2682_s23 + $0x74] sm:$0xf] %vm826_vm0, %v1165_v25  ;;  %1280 = vst [vmem:[%s1239_s13 + $0x50] sm:$0xff] (%p2526_p10), %v1279_v45  }
 0x362   : > { %v1134_v27 = vpop.permute.xlu0 %1133 }
 0x363   : > { %2015 = vst.msk [vmem:[%s2666_s21 + $0x78] sm:$0xf] %vm826_vm0, %v1134_v27 }
 0x364   : > { %v938_v28 = vpop.permute.xlu1 %937  ;;  %v1295_v49 = vld [vmem:[%s2682_s23 + $0x50] sm:$0xff] (%p2526_p10)  }
 0x365   : > { %1968 = vst.msk [vmem:[%s2666_s21 + $0x3c] sm:$0xf] %vm826_vm0, %v938_v28  ;;  %1296 = vst [vmem:[%s1239_s13 + $0x90] sm:$0xff] (%p2526_p10), %v1295_v49  }
 0x366   : > { %v969_v29 = vpop.permute.xlu0 %968 }
 0x367   : > { %1975 = vst.msk [vmem:[%s2682_s23 + $0x38] sm:$0xf] %vm826_vm0, %v969_v29 }
 0x368   : > { %v1037_v5 = vpop.permute.xlu1 %1036  ;;  %v1311_v52 = vld [vmem:[%s2682_s23 + $0x70] sm:$0xff] (%p2526_p10)  }
 0x369   : > { %1992 = vst.msk [vmem:[%s2666_s21 + $0x5c] sm:$0xf] %vm826_vm0, %v1037_v5  ;;  %1312 = vst [vmem:[%s1239_s13 + $0xd0] sm:$0xff] (%p2526_p10), %v1311_v52  }
 0x36a   : > { %v1068_v7 = vpop.permute.xlu0 %1067 }
 0x36b   : > { %1999 = vst.msk [vmem:[%s2682_s23 + $0x58] sm:$0xf] %vm826_vm0, %v1068_v7 }
 0x36c   : > { %v1136_v26 = vpop.permute.xlu1 %1135 }
 0x36d   : > { %2016 = vst.msk [vmem:[%s2666_s21 + $0x7c] sm:$0xf] %vm826_vm0, %v1136_v26 }
 0x36e   : > { %v1167_v30 = vpop.permute.xlu0 %1166 }
 0x36f   : > { %2023 = vst.msk [vmem:[%s2682_s23 + $0x78] sm:$0xf] %vm826_vm0, %v1167_v30 }
 0x370   : > { %v971_v33 = vpop.permute.xlu1 %970 }
 0x371   : > { %1976 = vst.msk [vmem:[%s2682_s23 + $0x3c] sm:$0xf] %vm826_vm0, %v971_v33 }
 0x372   : > { %v1200_v34 = vpop.permute.xlu0 %1199 }
 0x373   : > { %2031 = vst.msk [vmem:[%s2693_s24 + $0x78] sm:$0xf] %vm826_vm0, %v1200_v34 }
 0x374   : > { %v1070_v35 = vpop.permute.xlu1 %1069 }
 0x375   : > { %2000 = vst.msk [vmem:[%s2682_s23 + $0x5c] sm:$0xf] %vm826_vm0, %v1070_v35 }
 0x377   : > { %1234 = sbr.rel (!%p2526_p10) target bundleno = 898 (0x382), region = 52 }
 0x378   : > { %v1169_v36 = vpop.permute.xlu1 %1168  ;;  %v1283_v46 = vld [vmem:[%s2682_s23 + $0x38] sm:$0xff] (%p2526_p10)  }
 0x379   : > { %2024 = vst.msk [vmem:[%s2682_s23 + $0x7c] sm:$0xf] %vm826_vm0, %v1169_v36  ;;  %1284 = vst [vmem:[%s1239_s13 + $0x58] sm:$0xff] (%p2526_p10), %v1283_v46  }
 0x37c   : > { %v1202_v37 = vpop.permute.xlu1 %1201  ;;  %v1299_v23 = vld [vmem:[%s2682_s23 + $0x58] sm:$0xff] (%p2526_p10)  }
 0x37d   : > { %2032 = vst.msk [vmem:[%s2693_s24 + $0x7c] sm:$0xf] %vm826_vm0, %v1202_v37  ;;  %1300 = vst [vmem:[%s1239_s13 + $0x98] sm:$0xff] (%p2526_p10), %v1299_v23  }
 0x380   : > { %v1315_v53 = vld [vmem:[%s2682_s23 + $0x78] sm:$0xff]  }
 0x381   : > { %1316 = vst [vmem:[%s1239_s13 + $0xd8] sm:$0xff] %v1315_v53  }
 0x382 PF: > { %1405 = sbr.rel (!%p2526_p10) target bundleno = 917 (0x395), region = 93  ;;  %s3219_s11 = sld [smem:[#allocation11_spill]] (%p2526_p10)  ;;  %v1426_v17 = vld [vmem:[%s2666_s21] sm:$0xff] (%p2526_p10)   ;;  %v1430_v54 = vld [vmem:[%s2666_s21 + $0x8] sm:$0xff] (%p2526_p10)   ;;  %v1434_v55 = vld [vmem:[%s2666_s21 + $0x10] sm:$0xff] (%p2526_p10)  }
 0x383   : > { %s3220_s22 = sld [smem:[#allocation12_spill]] (%p2526_p10)  ;;  %v1438_v56 = vld [vmem:[%s2666_s21 + $0x18] sm:$0xff] (%p2526_p10)   ;;  %v1442_v57 = vld [vmem:[%s2666_s21 + $0x20] sm:$0xff] (%p2526_p10)   ;;  %v1446_v24 = vld [vmem:[%s2666_s21 + $0x28] sm:$0xff] (%p2526_p10)   ;;  %s3221_s18 = sld [smem:[#allocation16_spill]] (%p2526_p10) }
 0x384   : > { %v1450_v31 = vld [vmem:[%s2666_s21 + $0x30] sm:$0xff] (%p2526_p10)   ;;  %v1454_v58 = vld [vmem:[%s2666_s21 + $0x38] sm:$0xff] (%p2526_p10)   ;;  %v1458_v59 = vld [vmem:[%s2666_s21 + $0x40] sm:$0xff] (%p2526_p10)  }
 0x385   : > { %v1462_v60 = vld [vmem:[%s2666_s21 + $0x48] sm:$0xff] (%p2526_p10)   ;;  %v1466_v61 = vld [vmem:[%s2666_s21 + $0x50] sm:$0xff] (%p2526_p10)   ;;  %v1470_v62 = vld [vmem:[%s2666_s21 + $0x58] sm:$0xff] (%p2526_p10)  }
 0x386   : > { %v1474_v0 = vld [vmem:[%s2666_s21 + $0x60] sm:$0xff] (%p2526_p10)   ;;  %v1478_v32 = vld [vmem:[%s2666_s21 + $0x68] sm:$0xff] (%p2526_p10)   ;;  %v1482_v1 = vld [vmem:[%s2666_s21 + $0x70] sm:$0xff] (%p2526_p10)  }
 0x387   : > { %v1486_v39 = vld [vmem:[%s2666_s21 + $0x78] sm:$0xff] (%p2526_p10)  }
 0x388   : > { %s2039_s3 = sshll.u32 (%p2526_p10), %s3219_s11, 3 }
 0x389   : > { %s2040_s16 = sshll.u32 %s3220_s22, 6 }
 0x38a   : > { %s1408_s23 = sadd.s32 %s2040_s16, %s2039_s3 }
 0x38b   : > { %s2041_s9 = sshll.u32 %s1408_s23, 2 }
 0x38c   : > { %s1410_s19 = scalar_lea.vmem %s3221_s18, %s2041_s9 }
 0x38d   : > { %1427 = vst [vmem:[%s1410_s19] sm:$0xff] %v1426_v17   ;;  %1431 = vst [vmem:[%s1410_s19 + $0x8] sm:$0xff] %v1430_v54  }
 0x38e   : > { %1435 = vst [vmem:[%s1410_s19 + $0x10] sm:$0xff] %v1434_v55   ;;  %1439 = vst [vmem:[%s1410_s19 + $0x18] sm:$0xff] %v1438_v56  }
 0x38f   : > { %1443 = vst [vmem:[%s1410_s19 + $0x40] sm:$0xff] %v1442_v57   ;;  %1447 = vst [vmem:[%s1410_s19 + $0x48] sm:$0xff] %v1446_v24  }
 0x390   : > { %1451 = vst [vmem:[%s1410_s19 + $0x50] sm:$0xff] %v1450_v31   ;;  %1455 = vst [vmem:[%s1410_s19 + $0x58] sm:$0xff] %v1454_v58  }
 0x391   : > { %1459 = vst [vmem:[%s1410_s19 + $0x80] sm:$0xff] %v1458_v59   ;;  %1463 = vst [vmem:[%s1410_s19 + $0x88] sm:$0xff] %v1462_v60  }
 0x392   : > { %1467 = vst [vmem:[%s1410_s19 + $0x90] sm:$0xff] %v1466_v61   ;;  %1471 = vst [vmem:[%s1410_s19 + $0x98] sm:$0xff] %v1470_v62  }
 0x393   : > { %1475 = vst [vmem:[%s1410_s19 + $0xc0] sm:$0xff] %v1474_v0   ;;  %1479 = vst [vmem:[%s1410_s19 + $0xc8] sm:$0xff] %v1478_v32  }
 0x394   : > { %1483 = vst [vmem:[%s1410_s19 + $0xd0] sm:$0xff] %v1482_v1   ;;  %1487 = vst [vmem:[%s1410_s19 + $0xd8] sm:$0xff] %v1486_v39  }
 0x395 PF: > { %1576 = sbr.rel (!%p2526_p10) target bundleno = 936 (0x3a8), region = 134  ;;  %s3222_s5 = sld [smem:[#allocation11_spill]] (%p2526_p10)  ;;  %v1597_v2 = vld [vmem:[%s2693_s24] sm:$0xff] (%p2526_p10)   ;;  %v1601_v3 = vld [vmem:[%s2693_s24 + $0x8] sm:$0xff] (%p2526_p10)   ;;  %v1605_v40 = vld [vmem:[%s2693_s24 + $0x10] sm:$0xff] (%p2526_p10)  }
 0x396   : > { %s3223_s6 = sld [smem:[#allocation12_spill]] (%p2526_p10)  ;;  %v1609_v4 = vld [vmem:[%s2693_s24 + $0x18] sm:$0xff] (%p2526_p10)   ;;  %v1613_v6 = vld [vmem:[%s2693_s24 + $0x20] sm:$0xff] (%p2526_p10)   ;;  %v1617_v8 = vld [vmem:[%s2693_s24 + $0x28] sm:$0xff] (%p2526_p10)   ;;  %s3224_s13 = sld [smem:[#allocation17_spill]] (%p2526_p10) }
 0x397   : > { %v1621_v63 = vld [vmem:[%s2693_s24 + $0x30] sm:$0xff] (%p2526_p10)   ;;  %v1625_v9 = vld [vmem:[%s2693_s24 + $0x38] sm:$0xff] (%p2526_p10)   ;;  %v1629_v10 = vld [vmem:[%s2693_s24 + $0x40] sm:$0xff] (%p2526_p10)  }
 0x398   : > { %v1633_v11 = vld [vmem:[%s2693_s24 + $0x48] sm:$0xff] (%p2526_p10)   ;;  %v1637_v12 = vld [vmem:[%s2693_s24 + $0x50] sm:$0xff] (%p2526_p10)   ;;  %v1641_v13 = vld [vmem:[%s2693_s24 + $0x58] sm:$0xff] (%p2526_p10)  }
 0x399   : > { %v1645_v14 = vld [vmem:[%s2693_s24 + $0x60] sm:$0xff] (%p2526_p10)   ;;  %v1649_v15 = vld [vmem:[%s2693_s24 + $0x68] sm:$0xff] (%p2526_p10)   ;;  %v1653_v18 = vld [vmem:[%s2693_s24 + $0x70] sm:$0xff] (%p2526_p10)  }
 0x39a   : > { %v1657_v19 = vld [vmem:[%s2693_s24 + $0x78] sm:$0xff] (%p2526_p10)  }
 0x39b   : > { %s2042_s28 = sshll.u32 (%p2526_p10), %s3222_s5, 3 }
 0x39c   : > { %s2043_s21 = sshll.u32 %s3223_s6, 6 }
 0x39d   : > { %s1579_s15 = sadd.s32 %s2043_s21, %s2042_s28 }
 0x39e   : > { %s2044_s27 = sshll.u32 %s1579_s15, 2 }
 0x39f   : > { %s1581_s11 = scalar_lea.vmem %s3224_s13, %s2044_s27 }
 0x3a0   : > { %1598 = vst [vmem:[%s1581_s11] sm:$0xff] %v1597_v2   ;;  %1602 = vst [vmem:[%s1581_s11 + $0x8] sm:$0xff] %v1601_v3  }
 0x3a1   : > { %1606 = vst [vmem:[%s1581_s11 + $0x10] sm:$0xff] %v1605_v40   ;;  %1610 = vst [vmem:[%s1581_s11 + $0x18] sm:$0xff] %v1609_v4  }
 0x3a2   : > { %1614 = vst [vmem:[%s1581_s11 + $0x40] sm:$0xff] %v1613_v6   ;;  %1618 = vst [vmem:[%s1581_s11 + $0x48] sm:$0xff] %v1617_v8  }
 0x3a3   : > { %1622 = vst [vmem:[%s1581_s11 + $0x50] sm:$0xff] %v1621_v63   ;;  %1626 = vst [vmem:[%s1581_s11 + $0x58] sm:$0xff] %v1625_v9  }
 0x3a4   : > { %1630 = vst [vmem:[%s1581_s11 + $0x80] sm:$0xff] %v1629_v10   ;;  %1634 = vst [vmem:[%s1581_s11 + $0x88] sm:$0xff] %v1633_v11  }
 0x3a5   : > { %1638 = vst [vmem:[%s1581_s11 + $0x90] sm:$0xff] %v1637_v12   ;;  %1642 = vst [vmem:[%s1581_s11 + $0x98] sm:$0xff] %v1641_v13  }
 0x3a6   : > { %1646 = vst [vmem:[%s1581_s11 + $0xc0] sm:$0xff] %v1645_v14   ;;  %1650 = vst [vmem:[%s1581_s11 + $0xc8] sm:$0xff] %v1649_v15  }
 0x3a7   : > { %1654 = vst [vmem:[%s1581_s11 + $0xd0] sm:$0xff] %v1653_v18   ;;  %1658 = vst [vmem:[%s1581_s11 + $0xd8] sm:$0xff] %v1657_v19  }
 0x3a8 PF: > { %s22_s8 = sadd.s32 1, %s2373_s8   ;;  %s3225_s22 = sld [smem:[#allocation13_spill]] }
 0x3a9   : > { %p19_p10 = scmp.ge.s32.totalorder %s22_s8, 6   ;;  %s3226_s24 = smov %s2349_s25 }
 0x3aa   : > { %s3227_s25 = smov %s2353_s26  ;;  %s3228_s26 = smov %s2539_s7 }
 0x3ab   : > { %s3229_s27 = smov %s2365_s29  ;;  %s3230_s28 = smov %s2369_s30 }
 0x3ac   : > { %s3232_s30 = smov %s3238_s20  ;;  %21 = sbr.rel (!%p19_p10) target bundleno = 11 (0xb), region = 240 }
 0x3ae   : > { %s3231_s29 = smov %s3225_s22 }
 0x3b3   :  { %1771 = vsyncpa [#allocation3], 1 }
 0x3b4   :  { %1773 = vsyncpa [#allocation3 + $0x1], 1 }
 0x3b5   :  { %1774 = vsyncpa [#allocation5], 1 }

</bundles_post_ra>
